<compile_context>
chip_gen: v7x
topology: tpu7x:2x2x1
jax: 0.10.0
libtpu: 0.0.40
codegen_flags: <defaults>
</compile_context>

<pallas_src>
import functools

import jax
import jax.numpy as jnp
from jax.experimental import pallas as pl
from jax.experimental.pallas import tpu as pltpu

EPS = 1e-5  # nn.BatchNorm2d default eps

# ----------------------------- fixed descriptor ----------------------------
NZ, NGF, NC = 16, 16, 3
C0, C1 = 32, 16            # opChannels
S0, S1, S2 = 4, 4, 8       # spatial sizes after layers 0, 1, 2
ACTIVATIONS = [1, 0]       # 1 = ReLU, 0 = LeakyReLU(0.2)


# ----------------------------- Pallas kernel -------------------------------

def _bn_act(a, p_ref, pt_ref, g_ref, b_ref, inv_r, act):
    """BatchNorm2d (training-mode batch stats) + activation on a (B, C*H*W) tile.

    Per-channel stats are gathered with a single stacked 0/1 pooling matmul
    (columns are (c,h,w)-flattened) and re-broadcast with a single stacked
    matmul, avoiding in-kernel reshapes and keeping lanes dense.
    """
    s1 = jnp.sum(a, axis=0, keepdims=True)             # (1, C*HW) column sums
    s2 = jnp.sum(a * a, axis=0, keepdims=True)         # (1, C*HW) column sum-of-squares
    stats = jnp.concatenate([s1, s2], axis=0)          # (2, C*HW)
    pooled = jnp.dot(stats, p_ref[...],
                     preferred_element_type=jnp.float32) * inv_r      # (2, C)
    mean_c = pooled[0:1, :]
    ex2_c = pooled[1:2, :]
    var_c = jnp.maximum(ex2_c - mean_c * mean_c, 0.0)   # biased variance (PyTorch norm.)
    scale_c = g_ref[...] * jax.lax.rsqrt(var_c + EPS)   # gamma folded into scale (EUP rsqrt)
    shift_c = b_ref[...] - mean_c * scale_c
    affine = jnp.concatenate([scale_c, shift_c], axis=0)               # (2, C)
    aff_f = jnp.dot(affine, pt_ref[...],
                    preferred_element_type=jnp.float32)                # (2, C*HW)
    y = a * aff_f[0:1, :] + aff_f[1:2, :]
    if act == 1:      # ReLU
        return jnp.maximum(y, 0.0)
    elif act == 0:    # LeakyReLU(0.2)
        return jnp.where(y > 0, y, 0.2 * y)
    elif act == 2:    # ELU(alpha=1)
        return jnp.where(y > 0, y, jnp.exp(y) - 1.0)
    return y


def generator_kernel(z_ref, m0_ref, p0_ref, pt0_ref, g0_ref, b0_ref,
                     m1_ref, p1_ref, pt1_ref, g1_ref, b1_ref,
                     m2_ref, out_ref, *, inv_r0, inv_r1):
    # Layer 0: ConvT(16,32,4,1,0) == dense matmul (1x1 input) + BN + ReLU
    a = jnp.dot(z_ref[...], m0_ref[...], preferred_element_type=jnp.float32)   # (B, 512)
    a = _bn_act(a, p0_ref, pt0_ref, g0_ref, b0_ref, inv_r0, act=ACTIVATIONS[0])
    # Layer 1: "same" ConvT(32,16,3,1,1) as block-Toeplitz matmul + BN + LeakyReLU
    a = jnp.dot(a, m1_ref[...], preferred_element_type=jnp.float32)            # (B, 256)
    a = _bn_act(a, p1_ref, pt1_ref, g1_ref, b1_ref, inv_r1, act=ACTIVATIONS[1])
    # Layer 2: ConvT(16,3,4,2,1) as block-Toeplitz matmul + Tanh (EUP)
    a = jnp.dot(a, m2_ref[...], preferred_element_type=jnp.float32)            # (B, 192)
    out_ref[...] = jnp.tanh(a)


# ----------------------------- weight preprocessing (runs once) ------------

def convt_as_matrix(W, Hin, Win, stride, padding):
    """Fold ConvTranspose2d(weight W: (Cin,Cout,K,K)) into a dense matrix that maps
    a (Cin*Hin*Win,) flattened-NCHW input to a (Cout*Hout*Wout,) flattened-NCHW output.
      out[co,oy,ox] = sum_{ci,iy,ix} in[ci,iy,ix] * W[ci,co, oy-iy*s+p, ox-ix*s+p]  (if valid)
    """
    Cin, Cout, K, _ = W.shape
    Hout = (Hin - 1) * stride - 2 * padding + K
    Wout = (Win - 1) * stride - 2 * padding + K
    iy = jnp.arange(Hin)[:, None]
    oy = jnp.arange(Hout)[None, :]
    ky = oy - iy * stride + padding                          # (Hin, Hout)
    ix = jnp.arange(Win)[:, None]
    ox = jnp.arange(Wout)[None, :]
    kx = ox - ix * stride + padding                          # (Win, Wout)
    vy = (ky >= 0) & (ky < K)
    vx = (kx >= 0) & (kx < K)
    kyc = jnp.clip(ky, 0, K - 1)
    kxc = jnp.clip(kx, 0, K - 1)
    # (Cin, Cout, Hin, Hout, Win, Wout)
    Wg = W[:, :, kyc[:, :, None, None], kxc[None, None, :, :]]
    mask = (vy[:, :, None, None] & vx[None, None, :, :]).astype(W.dtype)
    Wg = Wg * mask
    M = Wg.transpose(0, 2, 4, 1, 3, 5).reshape(Cin * Hin * Win, Cout * Hout * Wout)
    return M.astype(jnp.float32)


def channel_pool_matrix(C, HW):
    # (C*HW, C) 0/1 matrix: column-sum pooling over (c,h,w)-flattened columns.
    return jnp.repeat(jnp.eye(C, dtype=jnp.float32), HW, axis=0)


def init_params(key):
    k0, k1, k2, k3, k4 = jax.random.split(key, 5)
    return {
        # ConvTranspose2d weights are (Cin, Cout, K, K); DCGAN-style N(0, 0.02)
        "W0": 0.02 * jax.random.normal(k0, (NZ, C0, 4, 4), jnp.float32),
        "g0": 1.0 + 0.1 * jax.random.normal(k3, (C0,), jnp.float32),
        "b0": 0.1 * jax.random.normal(k4, (C0,), jnp.float32),
        "W1": 0.02 * jax.random.normal(k1, (C0, C1, 3, 3), jnp.float32),
        "g1": jnp.ones((C1,), jnp.float32),
        "b1": jnp.zeros((C1,), jnp.float32),
        "W2": 0.02 * jax.random.normal(k2, (NGF, NC, 4, 4), jnp.float32),
    }


def prepare_params(params):
    """Hoisted (one-time) weight preprocessing: block-Toeplitz matrices, BN pooling
    matrices, and (1, C) gamma/beta."""
    p0 = channel_pool_matrix(C0, S0 * S0)   # (512, 32)
    p1 = channel_pool_matrix(C1, S1 * S1)   # (256, 16)
    return {
        "m0": convt_as_matrix(params["W0"], 1, 1, 1, 0),      # (16, 512)
        "m1": convt_as_matrix(params["W1"], S0, S0, 1, 1),    # (512, 256)
        "m2": convt_as_matrix(params["W2"], S1, S1, 2, 1),    # (256, 192)
        "p0": p0, "pt0": p0.T,
        "p1": p1, "pt1": p1.T,
        "g0": params["g0"].reshape(1, C0).astype(jnp.float32),
        "b0": params["b0"].reshape(1, C0).astype(jnp.float32),
        "g1": params["g1"].reshape(1, C1).astype(jnp.float32),
        "b1": params["b1"].reshape(1, C1).astype(jnp.float32),
    }


# ----------------------------- forward (single pallas_call) ----------------

@jax.jit
def generator_forward(prep, z):
    B = z.shape[0]
    z2d = z.reshape(B, NZ).astype(jnp.float32)
    vmem = pl.BlockSpec(memory_space=pltpu.MemorySpace.VMEM)
    kernel = functools.partial(
        generator_kernel,
        inv_r0=1.0 / float(B * S0 * S0),
        inv_r1=1.0 / float(B * S1 * S1),
    )
    out2d = pl.pallas_call(
        kernel,
        out_shape=jax.ShapeDtypeStruct((B, NC * S2 * S2), jnp.float32),
        in_specs=[vmem] * 12,
        out_specs=vmem,
    )(z2d,
      prep["m0"], prep["p0"], prep["pt0"], prep["g0"], prep["b0"],
      prep["m1"], prep["p1"], prep["pt1"], prep["g1"], prep["b1"],
      prep["m2"])
    # Columns are (c, h, w)-ordered, so NCHW is a free reshape (no transpose).
    return out2d.reshape(B, NC, S2, S2)


# ----------------------------- independent pure-JAX reference --------------

def _ref_convT(x, W, K, stride, padding):
    # ConvTranspose2d via zero-dilation + edge padding + flipped-kernel correlation.
    B, C, H, Wd = x.shape
    if stride > 1:
        d = jnp.zeros((B, C, (H - 1) * stride + 1, (Wd - 1) * stride + 1), x.dtype)
        d = d.at[:, :, ::stride, ::stride].set(x)
    else:
        d = x
    pad = K - 1 - padding
    d = jnp.pad(d, ((0, 0), (0, 0), (pad, pad), (pad, pad)))
    Wf = jnp.flip(W, axis=(2, 3))
    OH, OW = d.shape[2] - K + 1, d.shape[3] - K + 1
    out = jnp.zeros((B, W.shape[1], OH, OW), x.dtype)
    for ky in range(K):
        for kx in range(K):
            patch = d[:, :, ky:ky + OH, kx:kx + OW]              # (B, Cin, OH, OW)
            out = out + jnp.einsum('bchw,cd->bdhw', patch, Wf[:, :, ky, kx])
    return out


def _ref_bn(x, gamma, beta):
    mean = jnp.mean(x, axis=(0, 2, 3), keepdims=True)
    var = jnp.mean(jnp.square(x - mean), axis=(0, 2, 3), keepdims=True)
    xh = (x - mean) * jax.lax.rsqrt(var + EPS)
    return xh * gamma[None, :, None, None] + beta[None, :, None, None]


@jax.jit
def reference_forward(params, z):
    x = _ref_convT(z.astype(jnp.float32), params["W0"], 4, 1, 0)
    x = jnp.maximum(_ref_bn(x, params["g0"], params["b0"]), 0.0)
    x = _ref_convT(x, params["W1"], 3, 1, 1)
    x = _ref_bn(x, params["g1"], params["b1"])
    x = jnp.where(x > 0, x, 0.2 * x)
    x = _ref_convT(x, params["W2"], 4, 2, 1)
    return jnp.tanh(x)


# ----------------------------- main ----------------------------------------

if __name__ == "__main__":
    key = jax.random.PRNGKey(0)
    kp, kz = jax.random.split(key)
    params = init_params(kp)
    prep = prepare_params(params)   # one-time weight preprocessing (hoisted)

    z = jax.random.normal(kz, (2, NZ, 1, 1), jnp.float32)   # NCHW latent

    out = generator_forward(prep, z)
    out = jax.block_until_ready(out)

    assert out.shape == (2, NC, S2, S2), out.shape
    assert bool(jnp.all(jnp.isfinite(out)))

    # Correctness check against an independent pure-JAX implementation.
    # TODO(synk): BatchNorm running_mean/running_var buffer updates (training state)
    # are not reproduced; batch statistics (train-mode) are used, as in the original.
    ref = jax.block_until_ready(reference_forward(params, z))
    err = float(jnp.max(jnp.abs(out - ref)))
    assert err < 1e-3, f"max abs diff vs reference: {err}"

    print("KERNEL_OK")
</pallas_src>

<mosaic_0001>
module attributes {stable_mosaic.version = 11 : i64} {
  func.func @generator_kernel(%arg0: memref<2x16xf32, #tpu.memory_space<vmem>>, %arg1: memref<16x512xf32, #tpu.memory_space<vmem>>, %arg2: memref<512x32xf32, #tpu.memory_space<vmem>>, %arg3: memref<32x512xf32, #tpu.memory_space<vmem>>, %arg4: memref<1x32xf32, #tpu.memory_space<vmem>>, %arg5: memref<1x32xf32, #tpu.memory_space<vmem>>, %arg6: memref<512x256xf32, #tpu.memory_space<vmem>>, %arg7: memref<256x16xf32, #tpu.memory_space<vmem>>, %arg8: memref<16x256xf32, #tpu.memory_space<vmem>>, %arg9: memref<1x16xf32, #tpu.memory_space<vmem>>, %arg10: memref<1x16xf32, #tpu.memory_space<vmem>>, %arg11: memref<256x192xf32, #tpu.memory_space<vmem>>, %arg12: memref<2x192xf32, #tpu.memory_space<vmem>>) attributes {dimension_semantics = [], scalar_prefetch = 0 : i64, scratch_operands = 0 : i64, tpu.core_type = #tpu.core_type<tc>} {
    %c0 = arith.constant 0 : index
    %c0_0 = arith.constant 0 : index
    %0 = vector.load %arg0[%c0, %c0_0] : memref<2x16xf32, #tpu.memory_space<vmem>>, vector<2x16xf32>
    %c0_1 = arith.constant 0 : index
    %c0_2 = arith.constant 0 : index
    %1 = vector.load %arg1[%c0_1, %c0_2] : memref<16x512xf32, #tpu.memory_space<vmem>>, vector<16x512xf32>
    %cst = arith.constant dense<0.000000e+00> : vector<2x512xf32>
    %2 = tpu.matmul %0, %1, %cst {dimension_numbers = #tpu.dot_dimension_numbers<[1], [0], [0], [1], [0, 0, 1, 1], [], []>} : vector<2x16xf32>, vector<16x512xf32>, vector<2x512xf32> -> vector<2x512xf32>
    %cst_3 = arith.constant dense<0.000000e+00> : vector<512xf32>
    %3 = vector.multi_reduction <add>, %2, %cst_3 [0] : vector<2x512xf32> to vector<512xf32>
    %4 = vector.shape_cast %3 : vector<512xf32> to vector<1x512xf32>
    %5 = arith.mulf %2, %2 : vector<2x512xf32>
    %cst_4 = arith.constant dense<0.000000e+00> : vector<512xf32>
    %6 = vector.multi_reduction <add>, %5, %cst_4 [0] : vector<2x512xf32> to vector<512xf32>
    %7 = vector.shape_cast %6 : vector<512xf32> to vector<1x512xf32>
    %8 = tpu.concatenate %4, %7 in 0 : vector<1x512xf32>, vector<1x512xf32> -> vector<2x512xf32>
    %c0_5 = arith.constant 0 : index
    %c0_6 = arith.constant 0 : index
    %9 = vector.load %arg2[%c0_5, %c0_6] : memref<512x32xf32, #tpu.memory_space<vmem>>, vector<512x32xf32>
    %cst_7 = arith.constant dense<0.000000e+00> : vector<2x32xf32>
    %10 = tpu.matmul %8, %9, %cst_7 {dimension_numbers = #tpu.dot_dimension_numbers<[1], [0], [0], [1], [0, 0, 1, 1], [], []>} : vector<2x512xf32>, vector<512x32xf32>, vector<2x32xf32> -> vector<2x32xf32>
    %cst_8 = arith.constant 3.125000e-02 : f32
    %11 = vector.broadcast %cst_8 : f32 to vector<2x32xf32>
    %12 = arith.mulf %10, %11 : vector<2x32xf32>
    %13 = vector.extract_strided_slice %12 {offsets = [0, 0], sizes = [1, 32], strides = [1, 1]} : vector<2x32xf32> to vector<1x32xf32>
    %14 = vector.extract_strided_slice %12 {offsets = [1, 0], sizes = [1, 32], strides = [1, 1]} : vector<2x32xf32> to vector<1x32xf32>
    %15 = arith.mulf %13, %13 : vector<1x32xf32>
    %16 = arith.subf %14, %15 : vector<1x32xf32>
    %cst_9 = arith.constant 0.000000e+00 : f32
    %17 = vector.broadcast %cst_9 : f32 to vector<1x32xf32>
    %18 = arith.maximumf %16, %17 : vector<1x32xf32>
    %c0_10 = arith.constant 0 : index
    %c0_11 = arith.constant 0 : index
    %19 = vector.load %arg4[%c0_10, %c0_11] : memref<1x32xf32, #tpu.memory_space<vmem>>, vector<1x32xf32>
    %cst_12 = arith.constant 9.99999974E-6 : f32
    %20 = vector.broadcast %cst_12 : f32 to vector<1x32xf32>
    %21 = arith.addf %18, %20 : vector<1x32xf32>
    %22 = math.rsqrt %21 : vector<1x32xf32>
    %23 = arith.mulf %19, %22 : vector<1x32xf32>
    %c0_13 = arith.constant 0 : index
    %c0_14 = arith.constant 0 : index
    %24 = vector.load %arg5[%c0_13, %c0_14] : memref<1x32xf32, #tpu.memory_space<vmem>>, vector<1x32xf32>
    %25 = arith.mulf %13, %23 : vector<1x32xf32>
    %26 = arith.subf %24, %25 : vector<1x32xf32>
    %27 = tpu.concatenate %23, %26 in 0 : vector<1x32xf32>, vector<1x32xf32> -> vector<2x32xf32>
    %c0_15 = arith.constant 0 : index
    %c0_16 = arith.constant 0 : index
    %28 = vector.load %arg3[%c0_15, %c0_16] : memref<32x512xf32, #tpu.memory_space<vmem>>, vector<32x512xf32>
    %cst_17 = arith.constant dense<0.000000e+00> : vector<2x512xf32>
    %29 = tpu.matmul %27, %28, %cst_17 {dimension_numbers = #tpu.dot_dimension_numbers<[1], [0], [0], [1], [0, 0, 1, 1], [], []>} : vector<2x32xf32>, vector<32x512xf32>, vector<2x512xf32> -> vector<2x512xf32>
    %30 = vector.extract_strided_slice %29 {offsets = [0, 0], sizes = [1, 512], strides = [1, 1]} : vector<2x512xf32> to vector<1x512xf32>
    %31 = vector.broadcast %30 : vector<1x512xf32> to vector<2x512xf32>
    %32 = arith.mulf %2, %31 : vector<2x512xf32>
    %33 = vector.extract_strided_slice %29 {offsets = [1, 0], sizes = [1, 512], strides = [1, 1]} : vector<2x512xf32> to vector<1x512xf32>
    %34 = vector.broadcast %33 : vector<1x512xf32> to vector<2x512xf32>
    %35 = arith.addf %32, %34 : vector<2x512xf32>
    %cst_18 = arith.constant 0.000000e+00 : f32
    %36 = vector.broadcast %cst_18 : f32 to vector<2x512xf32>
    %37 = arith.maximumf %35, %36 : vector<2x512xf32>
    %c0_19 = arith.constant 0 : index
    %c0_20 = arith.constant 0 : index
    %38 = vector.load %arg6[%c0_19, %c0_20] : memref<512x256xf32, #tpu.memory_space<vmem>>, vector<512x256xf32>
    %cst_21 = arith.constant dense<0.000000e+00> : vector<2x256xf32>
    %39 = tpu.matmul %37, %38, %cst_21 {dimension_numbers = #tpu.dot_dimension_numbers<[1], [0], [0], [1], [0, 0, 1, 1], [], []>} : vector<2x512xf32>, vector<512x256xf32>, vector<2x256xf32> -> vector<2x256xf32>
    %cst_22 = arith.constant dense<0.000000e+00> : vector<256xf32>
    %40 = vector.multi_reduction <add>, %39, %cst_22 [0] : vector<2x256xf32> to vector<256xf32>
    %41 = vector.shape_cast %40 : vector<256xf32> to vector<1x256xf32>
    %42 = arith.mulf %39, %39 : vector<2x256xf32>
    %cst_23 = arith.constant dense<0.000000e+00> : vector<256xf32>
    %43 = vector.multi_reduction <add>, %42, %cst_23 [0] : vector<2x256xf32> to vector<256xf32>
    %44 = vector.shape_cast %43 : vector<256xf32> to vector<1x256xf32>
    %45 = tpu.concatenate %41, %44 in 0 : vector<1x256xf32>, vector<1x256xf32> -> vector<2x256xf32>
    %c0_24 = arith.constant 0 : index
    %c0_25 = arith.constant 0 : index
    %46 = vector.load %arg7[%c0_24, %c0_25] : memref<256x16xf32, #tpu.memory_space<vmem>>, vector<256x16xf32>
    %cst_26 = arith.constant dense<0.000000e+00> : vector<2x16xf32>
    %47 = tpu.matmul %45, %46, %cst_26 {dimension_numbers = #tpu.dot_dimension_numbers<[1], [0], [0], [1], [0, 0, 1, 1], [], []>} : vector<2x256xf32>, vector<256x16xf32>, vector<2x16xf32> -> vector<2x16xf32>
    %cst_27 = arith.constant 3.125000e-02 : f32
    %48 = vector.broadcast %cst_27 : f32 to vector<2x16xf32>
    %49 = arith.mulf %47, %48 : vector<2x16xf32>
    %50 = vector.extract_strided_slice %49 {offsets = [0, 0], sizes = [1, 16], strides = [1, 1]} : vector<2x16xf32> to vector<1x16xf32>
    %51 = vector.extract_strided_slice %49 {offsets = [1, 0], sizes = [1, 16], strides = [1, 1]} : vector<2x16xf32> to vector<1x16xf32>
    %52 = arith.mulf %50, %50 : vector<1x16xf32>
    %53 = arith.subf %51, %52 : vector<1x16xf32>
    %cst_28 = arith.constant 0.000000e+00 : f32
    %54 = vector.broadcast %cst_28 : f32 to vector<1x16xf32>
    %55 = arith.maximumf %53, %54 : vector<1x16xf32>
    %c0_29 = arith.constant 0 : index
    %c0_30 = arith.constant 0 : index
    %56 = vector.load %arg9[%c0_29, %c0_30] : memref<1x16xf32, #tpu.memory_space<vmem>>, vector<1x16xf32>
    %cst_31 = arith.constant 9.99999974E-6 : f32
    %57 = vector.broadcast %cst_31 : f32 to vector<1x16xf32>
    %58 = arith.addf %55, %57 : vector<1x16xf32>
    %59 = math.rsqrt %58 : vector<1x16xf32>
    %60 = arith.mulf %56, %59 : vector<1x16xf32>
    %c0_32 = arith.constant 0 : index
    %c0_33 = arith.constant 0 : index
    %61 = vector.load %arg10[%c0_32, %c0_33] : memref<1x16xf32, #tpu.memory_space<vmem>>, vector<1x16xf32>
    %62 = arith.mulf %50, %60 : vector<1x16xf32>
    %63 = arith.subf %61, %62 : vector<1x16xf32>
    %64 = tpu.concatenate %60, %63 in 0 : vector<1x16xf32>, vector<1x16xf32> -> vector<2x16xf32>
    %c0_34 = arith.constant 0 : index
    %c0_35 = arith.constant 0 : index
    %65 = vector.load %arg8[%c0_34, %c0_35] : memref<16x256xf32, #tpu.memory_space<vmem>>, vector<16x256xf32>
    %cst_36 = arith.constant dense<0.000000e+00> : vector<2x256xf32>
    %66 = tpu.matmul %64, %65, %cst_36 {dimension_numbers = #tpu.dot_dimension_numbers<[1], [0], [0], [1], [0, 0, 1, 1], [], []>} : vector<2x16xf32>, vector<16x256xf32>, vector<2x256xf32> -> vector<2x256xf32>
    %67 = vector.extract_strided_slice %66 {offsets = [0, 0], sizes = [1, 256], strides = [1, 1]} : vector<2x256xf32> to vector<1x256xf32>
    %68 = vector.broadcast %67 : vector<1x256xf32> to vector<2x256xf32>
    %69 = arith.mulf %39, %68 : vector<2x256xf32>
    %70 = vector.extract_strided_slice %66 {offsets = [1, 0], sizes = [1, 256], strides = [1, 1]} : vector<2x256xf32> to vector<1x256xf32>
    %71 = vector.broadcast %70 : vector<1x256xf32> to vector<2x256xf32>
    %72 = arith.addf %69, %71 : vector<2x256xf32>
    %cst_37 = arith.constant 0.000000e+00 : f32
    %73 = vector.broadcast %cst_37 : f32 to vector<2x256xf32>
    %74 = arith.cmpf ogt, %72, %73 : vector<2x256xf32>
    %cst_38 = arith.constant 2.000000e-01 : f32
    %75 = vector.broadcast %cst_38 : f32 to vector<2x256xf32>
    %76 = arith.mulf %75, %72 : vector<2x256xf32>
    %77 = arith.select %74, %72, %76 : vector<2x256xi1>, vector<2x256xf32>
    %c0_39 = arith.constant 0 : index
    %c0_40 = arith.constant 0 : index
    %78 = vector.load %arg11[%c0_39, %c0_40] : memref<256x192xf32, #tpu.memory_space<vmem>>, vector<256x192xf32>
    %cst_41 = arith.constant dense<0.000000e+00> : vector<2x192xf32>
    %79 = tpu.matmul %77, %78, %cst_41 {dimension_numbers = #tpu.dot_dimension_numbers<[1], [0], [0], [1], [0, 0, 1, 1], [], []>} : vector<2x256xf32>, vector<256x192xf32>, vector<2x192xf32> -> vector<2x192xf32>
    %80 = math.tanh %79 : vector<2x192xf32>
    %c0_42 = arith.constant 0 : index
    %c0_43 = arith.constant 0 : index
    %81 = vector.load %arg12[%c0_42, %c0_43] : memref<2x192xf32, #tpu.memory_space<vmem>>, vector<2x192xf32>
    tpu.vector_store %arg12[%c0_42, %c0_43], %80 {strides = array<i32>} : memref<2x192xf32, #tpu.memory_space<vmem>>, vector<2x192xf32>,
    return
  }
}

</mosaic_0001>

<bundles_post_ra>
// kernel: generator_forward.1
= control target key start
LH: loop header
LB: loop body
LE: loop exit
PB: predicated region body
PF: predicated region fallthrough
CT: control target
= control target key end

     0   :  { %v1850_v3 = vmov 0.0   ;;  %vm50_vm0 = vcmask 130048   ;;  %vm196_vm1 = vcmask 1041408   ;;  %vm257_vm2 = vcmask 1040384   ;;  %s2982_s1 = inlined_call_operand.vmem [shape: f32[16,512], index: 1, kind: input, shape index: {}]   ;;  %s2983_s0 = inlined_call_operand.vmem [shape: f32[2,16], index: 0, kind: input, shape index: {}]   ;;  %s2984_s2 = inlined_call_operand.vmem [shape: f32[512,32], index: 2, kind: input, shape index: {}]   ;;  %s2985_s3 = inlined_call_operand.vmem [shape: f32[32,512], index: 3, kind: input, shape index: {}]   ;;  %s2986_s6 = inlined_call_operand.vmem [shape: f32[512,256], index: 6, kind: input, shape index: {}]   ;;  %s2987_s4 = inlined_call_operand.vmem [shape: f32[1,32], index: 4, kind: input, shape index: {}]   ;;  %s2988_s5 = inlined_call_operand.vmem [shape: f32[1,32], index: 5, kind: input, shape index: {}]   ;;  %s2989_s7 = inlined_call_operand.vmem [shape: f32[256,16], index: 7, kind: input, shape index: {}]   ;;  %s2990_s8 = inlined_call_operand.vmem [shape: f32[16,256], index: 8, kind: input, shape index: {}]   ;;  %s2991_s11 = inlined_call_operand.vmem [shape: f32[256,192], index: 11, kind: input, shape index: {}]   ;;  %s2992_s9 = inlined_call_operand.vmem [shape: f32[1,16], index: 9, kind: input, shape index: {}]   ;;  %s2993_s10 = inlined_call_operand.vmem [shape: f32[1,16], index: 10, kind: input, shape index: {}]   ;;  %s2994_s12 = inlined_call_operand.vmem [shape: f32[2,192], index: 12, kind: output, shape index: {}]  }
   0x1   :  { %v43_v0 = vld [vmem:[%s2982_s1 + $0x8] sm:$0xff]  ;;  %v42_v2 = vld [vmem:[%s2982_s1] sm:$0xff]  ;;  %118 = vmatprep.mubr.f32.mxu1 %v1850_v3  ;;  %v45_v6 = vld [vmem:[%s2982_s1 + $0x18] sm:$0xff]  ;;  %vm520_vm3 = vcmask 261120   ;;  %vm1404_vm6 = vcmask 519170  }
   0x2   :  { %v47_v1 = vld [vmem:[%s2982_s1 + $0x28] sm:$0xff]  ;;  %v46_v5 = vld [vmem:[%s2982_s1 + $0x20] sm:$0xff]  ;;  %v49_v9 = vld [vmem:[%s2982_s1 + $0x38] sm:$0xff] }
   0x3   :  { %v1521_v4 = vpack.c.bf16 %v47_v1, %v43_v0  ;;  %v1523_v7 = vpack.c.bf16 %v46_v5, %v42_v2  ;;  %v41_v8 = vld [vmem:[%s2983_s0] sm:$0x3]  ;;  %v44_v10 = vld [vmem:[%s2982_s1 + $0x10] sm:$0xff]  ;;  %v1525_v12 = vpack.c.bf16 %v49_v9, %v45_v6  ;;  %v279_v14 = vld [vmem:[%s2984_s2 + $0x88] sm:$0xff] }
   0x4   :  { %v48_v11 = vld [vmem:[%s2982_s1 + $0x30] sm:$0xff]  ;;  %v278_v13 = vld [vmem:[%s2984_s2 + $0x80] sm:$0xff]  ;;  %v263_v18 = vld [vmem:[%s2984_s2 + $0x8] sm:$0xff] }
   0x5   :  { %1522 = vmatprep.subr.bf16.mxu1 %v1521_v4  ;;  %v262_v15 = vld [vmem:[%s2984_s2] sm:$0xff]  ;;  %v1527_v16 = vpack.c.bf16 %v48_v11, %v44_v10  ;;  %v1529_v17 = vpack.c.bf16 %v279_v14, %v278_v13  ;;  %v280_v19 = vld [vmem:[%s2984_s2 + $0x90] sm:$0xff]  ;;  %v281_v20 = vld [vmem:[%s2984_s2 + $0x98] sm:$0xff] }
   0x6   :  { %1524 = vmatpush1.bf16.msra.mxu1 %v1523_v7  ;;  %v1531_v21 = vpack.c.bf16 %v263_v18, %v262_v15  ;;  %v1533_v22 = vpack.c.bf16 %v281_v20, %v280_v19  ;;  %v310_v23 = vld [vmem:[%s2984_s2 + $0x180] sm:$0xff]  ;;  %v311_v24 = vld [vmem:[%s2984_s2 + $0x188] sm:$0xff]  ;;  %v264_v25 = vld [vmem:[%s2984_s2 + $0x10] sm:$0xff] }
   0x7   :  { %1526 = vmatprep.subr.bf16.mxu1 %v1525_v12  ;;  %1530 = vmatprep.subr.bf16.mxu0 %v1529_v17  ;;  %v1561_v26 = vpack.c.bf16 %v311_v24, %v310_v23  ;;  %v265_v27 = vld [vmem:[%s2984_s2 + $0x18] sm:$0xff]  ;;  %v294_v28 = vld [vmem:[%s2984_s2 + $0x100] sm:$0xff]  ;;  %v295_v29 = vld [vmem:[%s2984_s2 + $0x108] sm:$0xff] }
   0x8   :  { %1532 = vmatpush3.bf16.msra.mxu0 %v1531_v21  ;;  %v1535_v30 = vpack.c.bf16 %v265_v27, %v264_v25  ;;  %v282_v31 = vld [vmem:[%s2984_s2 + $0xa0] sm:$0xff]  ;;  %v283_v32 = vld [vmem:[%s2984_s2 + $0xa8] sm:$0xff]  ;;  %v312_v33 = vld [vmem:[%s2984_s2 + $0x190] sm:$0xff]  ;;  %v1563_v34 = vpack.c.bf16 %v295_v29, %v294_v28 }
   0x9   :  { %1411 = vmatmul.mubr.msk.f32.vlgmr.msra.gmra.mrb[0].mxu1 %vm50_vm0, %v41_v8  ;;  %v1537_v35 = vpack.c.bf16 %v283_v32, %v282_v31  ;;  %v313_v36 = vld [vmem:[%s2984_s2 + $0x198] sm:$0xff]  ;;  %v266_v37 = vld [vmem:[%s2984_s2 + $0x20] sm:$0xff]  ;;  %v267_v38 = vld [vmem:[%s2984_s2 + $0x28] sm:$0xff]  ;;  %1534 = vmatprep.subr.bf16.mxu0 %v1533_v22 }
   0xa   :  { %1528 = vmatpush1.bf16.msra.mxu1 %v1527_v16  ;;  %189 = vmatprep.mubr.f32.mxu1 %v1850_v3  ;;  %v1565_v39 = vpack.c.bf16 %v313_v36, %v312_v33  ;;  %v296_v40 = vld [vmem:[%s2984_s2 + $0x110] sm:$0xff]  ;;  %v297_v41 = vld [vmem:[%s2984_s2 + $0x118] sm:$0xff]  ;;  %v314_v44 = vld [vmem:[%s2984_s2 + $0x1a0] sm:$0xff]  ;;  %v1539_v46 = vpack.c.bf16 %v267_v38, %v266_v37 }
   0xb   :  { %1562 = vmatprep.subr.bf16.mxu1 %v1561_v26  ;;  %v284_v42 = vld [vmem:[%s2984_s2 + $0xb0] sm:$0xff]  ;;  %v285_v43 = vld [vmem:[%s2984_s2 + $0xb8] sm:$0xff]  ;;  %v315_v45 = vld [vmem:[%s2984_s2 + $0x1a8] sm:$0xff]  ;;  %v1567_v47 = vpack.c.bf16 %v297_v41, %v296_v40 }
   0xc   :  { %1536 = vmatpush3.bf16.msra.mxu0 %v1535_v30  ;;  %v1541_v48 = vpack.c.bf16 %v285_v43, %v284_v42  ;;  %v1569_v49 = vpack.c.bf16 %v315_v45, %v314_v44  ;;  %v268_v50 = vld [vmem:[%s2984_s2 + $0x30] sm:$0xff]  ;;  %v269_v51 = vld [vmem:[%s2984_s2 + $0x38] sm:$0xff]  ;;  %v298_v52 = vld [vmem:[%s2984_s2 + $0x120] sm:$0xff] }
   0xd   :  { %1412 = vmatmul.mubr.msk.f32.vlgmr.msra.gmra.mrb[2].mxu1 %vm50_vm0, %v41_v8  ;;  %1538 = vmatprep.subr.bf16.mxu0 %v1537_v35  ;;  %v1543_v53 = vpack.c.bf16 %v269_v51, %v268_v50  ;;  %v299_v54 = vld [vmem:[%s2984_s2 + $0x128] sm:$0xff]  ;;  %v286_v56 = vld [vmem:[%s2984_s2 + $0xc0] sm:$0xff]  ;;  %v316_v58 = vld [vmem:[%s2984_s2 + $0x1b0] sm:$0xff] }
   0xe   :  { %1564 = vmatpush3.bf16.msra.mxu1 %v1563_v34  ;;  %v1571_v55 = vpack.c.bf16 %v299_v54, %v298_v52  ;;  %v287_v57 = vld [vmem:[%s2984_s2 + $0xc8] sm:$0xff]  ;;  %v317_v60 = vld [vmem:[%s2984_s2 + $0x1b8] sm:$0xff]  ;;  %v270_v61 = vld [vmem:[%s2984_s2 + $0x40] sm:$0xff] }
   0xf   :  { %1566 = vmatprep.subr.bf16.mxu1 %v1565_v39  ;;  %v1545_v59 = vpack.c.bf16 %v287_v57, %v286_v56  ;;  %v271_v62 = vld [vmem:[%s2984_s2 + $0x48] sm:$0xff]  ;;  %v1573_v63 = vpack.c.bf16 %v317_v60, %v316_v58  ;;  %v300_v1 = vld [vmem:[%s2984_s2 + $0x130] sm:$0xff]  ;;  %v301_v2 = vld [vmem:[%s2984_s2 + $0x138] sm:$0xff] }
  0x10   :  { %1540 = vmatpush3.bf16.msra.mxu0 %v1539_v46  ;;  %v1547_v0 = vpack.c.bf16 %v271_v62, %v270_v61  ;;  %v1575_v4 = vpack.c.bf16 %v301_v2, %v300_v1  ;;  %v288_v5 = vld [vmem:[%s2984_s2 + $0xd0] sm:$0xff]  ;;  %v289_v6 = vld [vmem:[%s2984_s2 + $0xd8] sm:$0xff]  ;;  %v318_v7 = vld [vmem:[%s2984_s2 + $0x1c0] sm:$0xff] }
  0x11   :  { %1542 = vmatprep.subr.bf16.mxu0 %v1541_v48  ;;  %v1549_v8 = vpack.c.bf16 %v289_v6, %v288_v5  ;;  %v319_v9 = vld [vmem:[%s2984_s2 + $0x1c8] sm:$0xff]  ;;  %v272_v10 = vld [vmem:[%s2984_s2 + $0x50] sm:$0xff]  ;;  %v273_v11 = vld [vmem:[%s2984_s2 + $0x58] sm:$0xff] }
  0x12   :  { %1568 = vmatpush3.bf16.msra.mxu1 %v1567_v47  ;;  %v1577_v12 = vpack.c.bf16 %v319_v9, %v318_v7  ;;  %v1551_v13 = vpack.c.bf16 %v273_v11, %v272_v10  ;;  %v302_v14 = vld [vmem:[%s2984_s2 + $0x140] sm:$0xff]  ;;  %v303_v15 = vld [vmem:[%s2984_s2 + $0x148] sm:$0xff]  ;;  %v320_v19 = vld [vmem:[%s2984_s2 + $0x1d0] sm:$0xff] }
  0x13   :  { %1570 = vmatprep.subr.bf16.mxu1 %v1569_v49  ;;  %v1579_v16 = vpack.c.bf16 %v303_v15, %v302_v14  ;;  %v290_v17 = vld [vmem:[%s2984_s2 + $0xe0] sm:$0xff]  ;;  %v291_v18 = vld [vmem:[%s2984_s2 + $0xe8] sm:$0xff]  ;;  %v321_v21 = vld [vmem:[%s2984_s2 + $0x1d8] sm:$0xff] }
  0x14   :  { %1544 = vmatpush3.bf16.msra.mxu0 %v1543_v53  ;;  %v1553_v20 = vpack.c.bf16 %v291_v18, %v290_v17  ;;  %v274_v22 = vld [vmem:[%s2984_s2 + $0x60] sm:$0xff]  ;;  %v275_v23 = vld [vmem:[%s2984_s2 + $0x68] sm:$0xff]  ;;  %v1581_v24 = vpack.c.bf16 %v321_v21, %v320_v19  ;;  %v304_v26 = vld [vmem:[%s2984_s2 + $0x150] sm:$0xff] }
  0x15   :  { %1546 = vmatprep.subr.bf16.mxu0 %v1545_v59  ;;  %v1555_v25 = vpack.c.bf16 %v275_v23, %v274_v22  ;;  %v305_v27 = vld [vmem:[%s2984_s2 + $0x158] sm:$0xff]  ;;  %v292_v29 = vld [vmem:[%s2984_s2 + $0xf0] sm:$0xff]  ;;  %v322_v31 = vld [vmem:[%s2984_s2 + $0x1e0] sm:$0xff] }
  0x16   :  { %1572 = vmatpush3.bf16.msra.mxu1 %v1571_v55  ;;  %v1583_v28 = vpack.c.bf16 %v305_v27, %v304_v26  ;;  %v293_v30 = vld [vmem:[%s2984_s2 + $0xf8] sm:$0xff]  ;;  %v323_v33 = vld [vmem:[%s2984_s2 + $0x1e8] sm:$0xff]  ;;  %v276_v34 = vld [vmem:[%s2984_s2 + $0x70] sm:$0xff] }
  0x17   :  { %1574 = vmatprep.subr.bf16.mxu1 %v1573_v63  ;;  %v1557_v32 = vpack.c.bf16 %v293_v30, %v292_v29  ;;  %v277_v35 = vld [vmem:[%s2984_s2 + $0x78] sm:$0xff]  ;;  %v1585_v36 = vpack.c.bf16 %v323_v33, %v322_v31  ;;  %v306_v38 = vld [vmem:[%s2984_s2 + $0x160] sm:$0xff]  ;;  %v307_v39 = vld [vmem:[%s2984_s2 + $0x168] sm:$0xff] }
  0x18   :  { %1548 = vmatpush3.bf16.msra.mxu0 %v1547_v0  ;;  %v1559_v37 = vpack.c.bf16 %v277_v35, %v276_v34  ;;  %v1587_v40 = vpack.c.bf16 %v307_v39, %v306_v38  ;;  %v324_v41 = vld [vmem:[%s2984_s2 + $0x1f0] sm:$0xff]  ;;  %v325_v42 = vld [vmem:[%s2984_s2 + $0x1f8] sm:$0xff]  ;;  %vm1405_vm7 = vmor %vm1404_vm6, %vm196_vm1 }
  0x19   :  { %1550 = vmatprep.subr.bf16.mxu0 %v1549_v8  ;;  %v308_v43 = vld [vmem:[%s2984_s2 + $0x170] sm:$0xff]  ;;  %v1589_v44 = vpack.c.bf16 %v325_v42, %v324_v41  ;;  %v309_v45 = vld [vmem:[%s2984_s2 + $0x178] sm:$0xff] }
  0x1a   :  { %1576 = vmatpush3.bf16.msra.mxu1 %v1575_v4  ;;  %v1591_v46 = vpack.c.bf16 %v309_v45, %v308_v43 }
  0x1b   :  { %1578 = vmatprep.subr.bf16.mxu1 %v1577_v12 }
  0x1c   :  { %1552 = vmatpush3.bf16.msra.mxu0 %v1551_v13 }
  0x1d   :  { %1554 = vmatprep.subr.bf16.mxu0 %v1553_v20 }
  0x1e   :  { %1580 = vmatpush3.bf16.msra.mxu1 %v1579_v16 }
  0x1f   :  { %1582 = vmatprep.subr.bf16.mxu1 %v1581_v24 }
  0x20   :  { %1556 = vmatpush3.bf16.msra.mxu0 %v1555_v25 }
  0x21   :  { %1558 = vmatprep.subr.bf16.mxu0 %v1557_v32 }
  0x22   :  { %1584 = vmatpush3.bf16.msra.mxu1 %v1583_v28 }
  0x23   :  { %1586 = vmatprep.subr.bf16.mxu1 %v1585_v36 }
  0x24   :  { %1560 = vmatpush3.bf16.msra.mxu0 %v1559_v37 }
  0x26   :  { %1588 = vmatpush3.bf16.msra.mxu1 %v1587_v40 }
  0x27   :  { %1590 = vmatprep.subr.bf16.mxu1 %v1589_v44 }
  0x2a   :  { %1592 = vmatpush3.bf16.msra.mxu1 %v1591_v46 }
  0xdc   :  { %v2141_v47 = vpop.f32.mrb[0].mxu1 }
  0xdd   :  { %v197_v48 = vsel %vm196_vm1, %v2141_v47, 0.0  ;;  %v225_v49 = vmul.f32 %v2141_v47, %v2141_v47  ;;  %v2147_v50 = vpop.f32.mrb[1].mxu1 }
  0xde   :  { %v198_v51 = vrot.slane %v197_v48, 4  ;;  %v204_v52 = vsel %vm196_vm1, %v2147_v50, 0.0  ;;  %v226_v53 = vmul.f32 %v2147_v50, %v2147_v50 }
  0xdf   :  { %v229_v54 = vsel %vm196_vm1, %v225_v49, 0.0  ;;  %v205_v55 = vrot.slane %v204_v52, 4 }
  0xe0   :  { %v199_v56 = vadd.f32 %v198_v51, %v197_v48  ;;  %v230_v57 = vrot.slane %v229_v54, 4  ;;  %v236_v58 = vsel %vm196_vm1, %v226_v53, 0.0  ;;  %v2155_v59 = vpop.f32.mrb[2].mxu1 }
  0xe1   :  { %v206_v60 = vadd.f32 %v205_v55, %v204_v52  ;;  %v237_v61 = vrot.slane %v236_v58, 4  ;;  %v211_v62 = vsel %vm196_vm1, %v2155_v59, 0.0  ;;  %v227_v63 = vmul.f32 %v2155_v59, %v2155_v59  ;;  %v2161_v0 = vpop.f32.mrb[3].mxu1  ;;  %v509_v55 = vld [vmem:[%s2985_s3 + $0x28] sm:$0xff] }
  0xe2   :  { %v200_v1 = vrot.slane %v199_v56, 2  ;;  %v231_v2 = vadd.f32 %v230_v57, %v229_v54  ;;  %v212_v4 = vrot.slane %v211_v62, 4  ;;  %v218_v5 = vsel %vm196_vm1, %v2161_v0, 0.0  ;;  %v505_v54 = vld [vmem:[%s2985_s3 + $0x8] sm:$0xff]  ;;  %v504_v57 = vld [vmem:[%s2985_s3] sm:$0xff] }
  0xe3   :  { %v207_v6 = vrot.slane %v206_v60, 2  ;;  %v238_v7 = vadd.f32 %v237_v61, %v236_v58  ;;  %v243_v8 = vsel %vm196_vm1, %v227_v63, 0.0  ;;  %v219_v9 = vrot.slane %v218_v5, 4  ;;  %v508_v58 = vld [vmem:[%s2985_s3 + $0x20] sm:$0xff]  ;;  %v513_v61 = vld [vmem:[%s2985_s3 + $0x48] sm:$0xff] }
  0xe4   :  { %v201_v10 = vadd.f32 %v200_v1, %v199_v56  ;;  %v232_v11 = vrot.slane %v231_v2, 2  ;;  %v213_v12 = vadd.f32 %v212_v4, %v211_v62  ;;  %v244_v13 = vrot.slane %v243_v8, 4  ;;  %v517_v62 = vld [vmem:[%s2985_s3 + $0x68] sm:$0xff]  ;;  %v512_v1 = vld [vmem:[%s2985_s3 + $0x40] sm:$0xff] }
  0xe5   :  { %v220_v14 = vadd.f32 %v219_v9, %v218_v5  ;;  %v228_v15 = vmul.f32 %v2161_v0, %v2161_v0  ;;  %v208_v16 = vadd.f32 %v207_v6, %v206_v60  ;;  %v239_v17 = vrot.slane %v238_v7, 2  ;;  %v507_v5 = vld [vmem:[%s2985_s3 + $0x18] sm:$0xff] }
  0xe6   :  { %v214_v18 = vrot.slane %v213_v12, 2  ;;  %v245_v19 = vadd.f32 %v244_v13, %v243_v8  ;;  %v233_v20 = vadd.f32 %v232_v11, %v231_v2  ;;  %v202_v27 = vrot.slane %v201_v10, 1  ;;  %v516_v2 = vld [vmem:[%s2985_s3 + $0x60] sm:$0xff]  ;;  %v511_v6 = vld [vmem:[%s2985_s3 + $0x38] sm:$0xff]  ;;  %v711_v8 = vld [vmem:[%s2986_s6 + $0x8] sm:$0xff] }
  0xe7   :  { %v221_v21 = vrot.slane %v220_v14, 2  ;;  %v250_v22 = vsel %vm196_vm1, %v228_v15, 0.0  ;;  %v209_v23 = vrot.slane %v208_v16, 1  ;;  %v240_v24 = vadd.f32 %v239_v17, %v238_v7  ;;  %v713_v9 = vld [vmem:[%s2986_s6 + $0x18] sm:$0xff]  ;;  %v715_v13 = vld [vmem:[%s2986_s6 + $0x28] sm:$0xff]  ;;  %v714_v17 = vld [vmem:[%s2986_s6 + $0x20] sm:$0xff] }
  0xe8   :  { %v246_v25 = vrot.slane %v245_v19, 2  ;;  %v251_v26 = vrot.slane %v250_v22, 4  ;;  %v234_v29 = vrot.slane %v233_v20, 1  ;;  %v215_v33 = vadd.f32 %v214_v18, %v213_v12  ;;  %v712_v12 = vld [vmem:[%s2986_s6 + $0x10] sm:$0xff] }
  0xe9   :  { %v241_v28 = vrot.slane %v240_v24, 1  ;;  %v222_v31 = vadd.f32 %v221_v21, %v220_v14  ;;  %v210_v34 = vadd.f32 %v209_v23, %v208_v16  ;;  %v203_v38 = vadd.f32 %v202_v27, %v201_v10  ;;  %v710_v10 = vld [vmem:[%s2986_s6] sm:$0xff]  ;;  %v717_v14 = vld [vmem:[%s2986_s6 + $0x38] sm:$0xff]  ;;  %v716_v18 = vld [vmem:[%s2986_s6 + $0x30] sm:$0xff] }
  0xea   :  { %v247_v30 = vadd.f32 %v246_v25, %v245_v19  ;;  %v252_v32 = vadd.f32 %v251_v26, %v250_v22  ;;  %v235_v36 = vadd.f32 %v234_v29, %v233_v20  ;;  %v216_v44 = vrot.slane %v215_v33, 1  ;;  %v719_v19 = vld [vmem:[%s2986_s6 + $0x48] sm:$0xff]  ;;  %v721_v20 = vld [vmem:[%s2986_s6 + $0x58] sm:$0xff]  ;;  %v718_v23 = vld [vmem:[%s2986_s6 + $0x40] sm:$0xff] }
  0xeb   :  { %v242_v35 = vadd.f32 %v241_v28, %v240_v24  ;;  %v223_v42 = vrot.slane %v222_v31, 1  ;;  %v1593_v56 = vpack.c.bf16 %v509_v55, %v505_v54  ;;  %v1595_v60 = vpack.c.bf16 %v508_v58, %v504_v57  ;;  %v720_v24 = vld [vmem:[%s2986_s6 + $0x50] sm:$0xff]  ;;  %v723_v25 = vld [vmem:[%s2986_s6 + $0x68] sm:$0xff]  ;;  %v725_v26 = vld [vmem:[%s2986_s6 + $0x78] sm:$0xff] }
  0xec   :  { %v253_v37 = vrot.slane %v252_v32, 2  ;;  %v248_v40 = vrot.slane %v247_v30, 1  ;;  %v258_v41 = vsel %vm257_vm2, %v203_v38, %v235_v36  ;;  %v217_v51 = vadd.f32 %v216_v44, %v215_v33  ;;  %v722_v29 = vld [vmem:[%s2986_s6 + $0x60] sm:$0xff]  ;;  %v728_v36 = vld [vmem:[%s2986_s6 + $0x90] sm:$0xff]  ;;  %v733_v38 = vld [vmem:[%s2986_s6 + $0xb8] sm:$0xff] }
  0xed   :  { %v259_v39 = vsel %vm257_vm2, %v210_v34, %v242_v35  ;;  %v224_v48 = vadd.f32 %v223_v42, %v222_v31  ;;  %1594 = vmatprep.subr.bf16.mxu1 %v1593_v56  ;;  %v1597_v63 = vpack.c.bf16 %v517_v62, %v513_v61  ;;  %v1599_v4 = vpack.c.bf16 %v516_v2, %v512_v1  ;;  %v727_v31 = vld [vmem:[%s2986_s6 + $0x88] sm:$0xff]  ;;  %v726_v35 = vld [vmem:[%s2986_s6 + $0x80] sm:$0xff]  ;;  %v732_v42 = vld [vmem:[%s2986_s6 + $0xb0] sm:$0xff] }
  0xee   :  { %390 = vmatprep.mubr.f32.mxu0 %v259_v39  ;;  %v254_v43 = vadd.f32 %v253_v37, %v252_v32  ;;  %v249_v46 = vadd.f32 %v248_v40, %v247_v30  ;;  %v1601_v7 = vpack.c.bf16 %v511_v6, %v507_v5  ;;  %v1609_v11 = vpack.c.bf16 %v713_v9, %v711_v8  ;;  %v724_v30 = vld [vmem:[%s2986_s6 + $0x70] sm:$0xff]  ;;  %v729_v32 = vld [vmem:[%s2986_s6 + $0x98] sm:$0xff]  ;;  %v731_v37 = vld [vmem:[%s2986_s6 + $0xa8] sm:$0xff] }
  0xef   :  { %391 = vmatmul.mubr.f32.vlgmr.msra.gmra.mrb[0].mxu0 %v258_v41  ;;  %v1611_v15 = vpack.c.bf16 %v712_v12, %v710_v10  ;;  %v1613_v16 = vpack.c.bf16 %v717_v14, %v715_v13  ;;  %v1615_v21 = vpack.c.bf16 %v716_v18, %v714_v17  ;;  %v1617_v22 = vpack.c.bf16 %v721_v20, %v719_v19  ;;  %v730_v41 = vld [vmem:[%s2986_s6 + $0xa0] sm:$0xff]  ;;  %v737_v44 = vld [vmem:[%s2986_s6 + $0xd8] sm:$0xff]  ;;  %v740_v56 = vld [vmem:[%s2986_s6 + $0xf0] sm:$0xff] }
  0xf0   :  { %v255_v45 = vrot.slane %v254_v43, 1  ;;  %v260_v53 = vsel %vm257_vm2, %v217_v51, %v249_v46  ;;  %1610 = vmatprep.subr.bf16.mxu0 %v1609_v11  ;;  %v1619_v27 = vpack.c.bf16 %v720_v24, %v718_v23  ;;  %v1621_v28 = vpack.c.bf16 %v725_v26, %v723_v25  ;;  %v739_v51 = vld [vmem:[%s2986_s6 + $0xe8] sm:$0xff]  ;;  %v738_v55 = vld [vmem:[%s2986_s6 + $0xe0] sm:$0xff]  ;;  %v745_v58 = vld [vmem:[%s2986_s6 + $0x118] sm:$0xff] }
  0xf1   :  { %1612 = vmatpush1.bf16.msra.mxu0 %v1611_v15  ;;  %v1623_v33 = vpack.c.bf16 %v724_v30, %v722_v29  ;;  %v1625_v34 = vpack.c.bf16 %v729_v32, %v727_v31  ;;  %v1627_v39 = vpack.c.bf16 %v728_v36, %v726_v35  ;;  %v1629_v40 = vpack.c.bf16 %v733_v38, %v731_v37  ;;  %v743_v57 = vld [vmem:[%s2986_s6 + $0x108] sm:$0xff]  ;;  %v742_v62 = vld [vmem:[%s2986_s6 + $0x100] sm:$0xff]  ;;  %v749_v2 = vld [vmem:[%s2986_s6 + $0x138] sm:$0xff] }
  0xf2   :  { %v256_v49 = vadd.f32 %v255_v45, %v254_v43  ;;  %1614 = vmatprep.subr.bf16.mxu0 %v1613_v16  ;;  %v735_v43 = vld [vmem:[%s2986_s6 + $0xc8] sm:$0xff]  ;;  %v1631_v45 = vpack.c.bf16 %v732_v42, %v730_v41  ;;  %v1641_v61 = vpack.c.bf16 %v745_v58, %v743_v57  ;;  %v746_v6 = vld [vmem:[%s2986_s6 + $0x120] sm:$0xff]  ;;  %v753_v9 = vld [vmem:[%s2986_s6 + $0x158] sm:$0xff] }
  0xf3   :  { %v1633_v46 = vpack.c.bf16 %v737_v44, %v735_v43  ;;  %v747_v1 = vld [vmem:[%s2986_s6 + $0x128] sm:$0xff]  ;;  %v750_v12 = vld [vmem:[%s2986_s6 + $0x140] sm:$0xff]  ;;  %v752_v13 = vld [vmem:[%s2986_s6 + $0x150] sm:$0xff] }
  0xf4   :  { %v261_v52 = vsel %vm257_vm2, %v224_v48, %v256_v49  ;;  %v734_v48 = vld [vmem:[%s2986_s6 + $0xc0] sm:$0xff]  ;;  %v736_v49 = vld [vmem:[%s2986_s6 + $0xd0] sm:$0xff]  ;;  %v1645_v5 = vpack.c.bf16 %v749_v2, %v747_v1  ;;  %v751_v8 = vld [vmem:[%s2986_s6 + $0x148] sm:$0xff]  ;;  %v1651_v16 = vpack.c.bf16 %v752_v13, %v750_v12 }
  0xf5   :  { %460 = vmatprep.mubr.f32.mxu1 %v261_v52  ;;  %1616 = vmatpush1.bf16.msra.mxu0 %v1615_v21  ;;  %v741_v52 = vld [vmem:[%s2986_s6 + $0xf8] sm:$0xff]  ;;  %v1649_v11 = vpack.c.bf16 %v753_v9, %v751_v8  ;;  %v755_v14 = vld [vmem:[%s2986_s6 + $0x168] sm:$0xff]  ;;  %v754_v18 = vld [vmem:[%s2986_s6 + $0x160] sm:$0xff] }
  0xf6   :  { %461 = vmatmul.mubr.f32.vlgmr.msra.gmra.mrb[4].mxu1 %v260_v53  ;;  %1618 = vmatprep.subr.bf16.mxu0 %v1617_v22  ;;  %v1635_v53 = vpack.c.bf16 %v736_v49, %v734_v48  ;;  %v1637_v54 = vpack.c.bf16 %v741_v52, %v739_v51  ;;  %v757_v15 = vld [vmem:[%s2986_s6 + $0x178] sm:$0xff]  ;;  %v756_v19 = vld [vmem:[%s2986_s6 + $0x170] sm:$0xff]  ;;  %v759_v20 = vld [vmem:[%s2986_s6 + $0x188] sm:$0xff]  ;;  %v480_v49 = vlaneseq }
  0xf7   :  { %588 = vmatprep.mubr.f32.mxu1 %v1850_v3  ;;  %1596 = vmatpush1.bf16.msra.mxu1 %v1595_v60  ;;  %v1639_v60 = vpack.c.bf16 %v740_v56, %v738_v55  ;;  %v1653_v17 = vpack.c.bf16 %v757_v15, %v755_v14  ;;  %v761_v21 = vld [vmem:[%s2986_s6 + $0x198] sm:$0xff]  ;;  %v1655_v22 = vpack.c.bf16 %v756_v19, %v754_v18  ;;  %v758_v24 = vld [vmem:[%s2986_s6 + $0x180] sm:$0xff]  ;;  %v760_v25 = vld [vmem:[%s2986_s6 + $0x190] sm:$0xff] }
  0xf8   :  { %1598 = vmatprep.subr.bf16.mxu1 %v1597_v63  ;;  %v744_v63 = vld [vmem:[%s2986_s6 + $0x110] sm:$0xff]  ;;  %v1657_v23 = vpack.c.bf16 %v761_v21, %v759_v20  ;;  %v763_v26 = vld [vmem:[%s2986_s6 + $0x1a8] sm:$0xff]  ;;  %v762_v30 = vld [vmem:[%s2986_s6 + $0x1a0] sm:$0xff]  ;;  %v2372_v52 = vshrl.u32 %v480_v49, 7 }
  0xf9   :  { %1620 = vmatpush1.bf16.msra.mxu0 %v1619_v27  ;;  %v765_v27 = vld [vmem:[%s2986_s6 + $0x1b8] sm:$0xff]  ;;  %v764_v31 = vld [vmem:[%s2986_s6 + $0x1b0] sm:$0xff]  ;;  %v473_v57 = vld [vmem:[%s2987_s4] sm:$0x1] }
  0xfa   :  { %1622 = vmatprep.subr.bf16.mxu0 %v1621_v28  ;;  %v1659_v28 = vpack.c.bf16 %v760_v25, %v758_v24  ;;  %v1661_v29 = vpack.c.bf16 %v765_v27, %v763_v26  ;;  %v1663_v32 = vpack.c.bf16 %v764_v31, %v762_v30  ;;  %v506_v1 = vld [vmem:[%s2985_s3 + $0x10] sm:$0xff]  ;;  %v767_v14 = vld [vmem:[%s2986_s6 + $0x1c8] sm:$0xff]  ;;  %v769_v15 = vld [vmem:[%s2986_s6 + $0x1d8] sm:$0xff] }
  0xfb   :  { %1600 = vmatpush1.bf16.msra.mxu1 %v1599_v4  ;;  %v1643_v4 = vpack.c.bf16 %v744_v63, %v742_v62  ;;  %v2386_v63 = vsub.s32 0, %v2372_v52  ;;  %v510_v2 = vld [vmem:[%s2985_s3 + $0x30] sm:$0xff]  ;;  %v771_v20 = vld [vmem:[%s2986_s6 + $0x1e8] sm:$0xff]  ;;  %v773_v21 = vld [vmem:[%s2986_s6 + $0x1f8] sm:$0xff] }
  0xfc   :  { %1602 = vmatprep.subr.bf16.mxu1 %v1601_v7  ;;  %v748_v7 = vld [vmem:[%s2986_s6 + $0x130] sm:$0xff]  ;;  %v1603_v8 = vpack.c.bf16 %v510_v2, %v506_v1  ;;  %v775_v26 = vld [vmem:[%s2986_s6 + $0x208] sm:$0xff]  ;;  %v777_v27 = vld [vmem:[%s2986_s6 + $0x218] sm:$0xff] }
  0xfd   :  { %1624 = vmatpush1.bf16.msra.mxu0 %v1623_v33  ;;  %v1647_v10 = vpack.c.bf16 %v748_v7, %v746_v6  ;;  %v519_v6 = vld [vmem:[%s2985_s3 + $0x78] sm:$0xff]  ;;  %v768_v18 = vld [vmem:[%s2986_s6 + $0x1d0] sm:$0xff]  ;;  %v1029_v30 = vld [vmem:[%s2989_s7 + $0x88] sm:$0xff] }
  0xfe   :  { %1626 = vmatprep.subr.bf16.mxu0 %v1625_v34  ;;  %v772_v24 = vld [vmem:[%s2986_s6 + $0x1f0] sm:$0xff]  ;;  %v1012_v31 = vld [vmem:[%s2989_s7] sm:$0xff] }
 0x101   :  { %1628 = vmatpush1.bf16.msra.mxu0 %v1627_v39 }
 0x102   :  { %1630 = vmatprep.subr.bf16.mxu0 %v1629_v40 }
 0x105   :  { %1632 = vmatpush1.bf16.msra.mxu0 %v1631_v45 }
 0x106   :  { %1634 = vmatprep.subr.bf16.mxu0 %v1633_v46  ;;  %v1851_v46 = vmov 1966171168  }
 0x107   :  { %v478_v48 = vunpack.c.l.s4 %v1851_v46  ;;  %v1034_v46 = vld [vmem:[%s2989_s7 + $0xb0] sm:$0xff] }
 0x109   :  { %1636 = vmatpush1.bf16.msra.mxu0 %v1635_v53  ;;  %v479_v51 = vunpack.c.0.s8 %v478_v48  ;;  %v1035_v48 = vld [vmem:[%s2989_s7 + $0xb8] sm:$0xff] }
 0x10a   :  { %1638 = vmatprep.subr.bf16.mxu0 %v1637_v54 }
 0x10b   :  { %v2375_v53 = vsub.s32 %v479_v51, %v2372_v52  ;;  %v1749_v51 = vpack.c.bf16 %v1035_v48, %v1034_v46  ;;  %v799_v46 = vld [vmem:[%s2986_s6 + $0x2c8] sm:$0xff]  ;;  %v801_v48 = vld [vmem:[%s2986_s6 + $0x2d8] sm:$0xff] }
 0x10d   :  { %1640 = vmatpush1.bf16.msra.mxu0 %v1639_v60 }
 0x10e   :  { %1642 = vmatprep.subr.bf16.mxu0 %v1641_v61  ;;  %v494_v61 = vld [vmem:[%s2988_s5] sm:$0x1] }
 0x111   :  { %1644 = vmatpush1.bf16.msra.mxu0 %v1643_v4 }
 0x112   :  { %1646 = vmatprep.subr.bf16.mxu0 %v1645_v5  ;;  %v515_v5 = vld [vmem:[%s2985_s3 + $0x58] sm:$0xff] }
 0x113   :  { %v1605_v9 = vpack.c.bf16 %v519_v6, %v515_v5  ;;  %v776_v5 = vld [vmem:[%s2986_s6 + $0x210] sm:$0xff] }
 0x115   :  { %1648 = vmatpush1.bf16.msra.mxu0 %v1647_v10  ;;  %v514_v10 = vld [vmem:[%s2985_s3 + $0x50] sm:$0xff] }
 0x116   :  { %1650 = vmatprep.subr.bf16.mxu0 %v1649_v11  ;;  %v518_v11 = vld [vmem:[%s2985_s3 + $0x70] sm:$0xff] }
 0x117   :  { %v1607_v13 = vpack.c.bf16 %v518_v11, %v514_v10 }
 0x119   :  { %1652 = vmatpush1.bf16.msra.mxu0 %v1651_v16  ;;  %v1665_v16 = vpack.c.bf16 %v769_v15, %v767_v14  ;;  %v778_v14 = vld [vmem:[%s2986_s6 + $0x220] sm:$0xff]  ;;  %v780_v15 = vld [vmem:[%s2986_s6 + $0x230] sm:$0xff] }
 0x11a   :  { %1654 = vmatprep.subr.bf16.mxu0 %v1653_v17  ;;  %v766_v17 = vld [vmem:[%s2986_s6 + $0x1c0] sm:$0xff] }
 0x11b   :  { %v1667_v19 = vpack.c.bf16 %v768_v18, %v766_v17  ;;  %v783_v17 = vld [vmem:[%s2986_s6 + $0x248] sm:$0xff]  ;;  %v785_v18 = vld [vmem:[%s2986_s6 + $0x258] sm:$0xff] }
 0x11d   :  { %1656 = vmatpush1.bf16.msra.mxu0 %v1655_v22  ;;  %v1669_v22 = vpack.c.bf16 %v773_v21, %v771_v20 }
 0x11e   :  { %1658 = vmatprep.subr.bf16.mxu0 %v1657_v23  ;;  %v770_v23 = vld [vmem:[%s2986_s6 + $0x1e0] sm:$0xff] }
 0x11f   :  { %v1671_v25 = vpack.c.bf16 %v772_v24, %v770_v23  ;;  %v1679_v23 = vpack.c.bf16 %v780_v15, %v778_v14  ;;  %v817_v14 = vld [vmem:[%s2986_s6 + $0x358] sm:$0xff] }
 0x121   :  { %1660 = vmatpush1.bf16.msra.mxu0 %v1659_v28  ;;  %v1673_v28 = vpack.c.bf16 %v777_v27, %v775_v26  ;;  %v782_v26 = vld [vmem:[%s2986_s6 + $0x240] sm:$0xff] }
 0x122   :  { %1662 = vmatprep.subr.bf16.mxu0 %v1661_v29  ;;  %v1028_v29 = vld [vmem:[%s2989_s7 + $0x80] sm:$0xff] }
 0x125   :  { %1664 = vmatpush1.bf16.msra.mxu0 %v1663_v32  ;;  %v1737_v32 = vpack.c.bf16 %v1029_v30, %v1028_v29 }
 0x126   :  { %1666 = vmatprep.subr.bf16.mxu0 %v1665_v16 }
 0x129   :  { %1668 = vmatpush1.bf16.msra.mxu0 %v1667_v19 }
 0x12a   :  { %1670 = vmatprep.subr.bf16.mxu0 %v1669_v22 }
 0x12d   :  { %1672 = vmatpush1.bf16.msra.mxu0 %v1671_v25  ;;  %v1681_v25 = vpack.c.bf16 %v785_v18, %v783_v17  ;;  %v814_v17 = vld [vmem:[%s2986_s6 + $0x340] sm:$0xff]  ;;  %v816_v18 = vld [vmem:[%s2986_s6 + $0x350] sm:$0xff] }
 0x12e   :  { %1674 = vmatprep.subr.bf16.mxu0 %v1673_v28  ;;  %v789_v28 = vld [vmem:[%s2986_s6 + $0x278] sm:$0xff] }
 0x1c2   :  { %v1448_v33 = vpop.f32.mrb[0].mxu0 }
 0x1c3   :  { %v1449_v34 = vpop.f32.mrb[1].mxu0 }
 0x1c4   :  { %v1450_v35 = vadd.f32 %v1449_v34, %v1448_v33  ;;  %v1013_v33 = vld [vmem:[%s2989_s7 + $0x8] sm:$0xff]  ;;  %v1030_v34 = vld [vmem:[%s2989_s7 + $0x90] sm:$0xff] }
 0x1c9   :  { %v1483_v36 = vpop.f32.mrb[4].mxu1 }
 0x1ca   :  { %v1484_v37 = vpop.f32.mrb[5].mxu1 }
 0x1cb   :  { %v1485_v38 = vadd.f32 %v1484_v37, %v1483_v36  ;;  %v1739_v36 = vpack.c.bf16 %v1013_v33, %v1012_v31  ;;  %v788_v33 = vld [vmem:[%s2986_s6 + $0x270] sm:$0xff] }
 0x1cd   :  { %v463_v39 = vadd.f32 %v1485_v38, %v1450_v35  ;;  %v1031_v35 = vld [vmem:[%s2989_s7 + $0x98] sm:$0xff]  ;;  %v1014_v38 = vld [vmem:[%s2989_s7 + $0x10] sm:$0xff] }
 0x1ce   :  { %v1741_v37 = vpack.c.bf16 %v1031_v35, %v1030_v34  ;;  %v791_v34 = vld [vmem:[%s2986_s6 + $0x288] sm:$0xff]  ;;  %v793_v35 = vld [vmem:[%s2986_s6 + $0x298] sm:$0xff] }
 0x1cf   :  { %v466_v40 = vmul.f32 0.03125, %v463_v39  ;;  %v1015_v39 = vld [vmem:[%s2989_s7 + $0x18] sm:$0xff] }
 0x1d1   :  { %v467_v41 = vmul.f32 %v466_v40, %v466_v40 }
 0x1d3   :  { %v469_v42 = vrot.slane %v467_v41, 7  ;;  %v1033_v41 = vld [vmem:[%s2989_s7 + $0xa8] sm:$0xff] }
 0x1d5   :  { %v471_v43 = vsub.f32 %v466_v40, %v469_v42  ;;  %v1743_v42 = vpack.c.bf16 %v1015_v39, %v1014_v38  ;;  %v790_v38 = vld [vmem:[%s2986_s6 + $0x280] sm:$0xff]  ;;  %v792_v39 = vld [vmem:[%s2986_s6 + $0x290] sm:$0xff] }
 0x1d7   :  { %v472_v44 = vmax.f32 %v471_v43, 0.0 }
 0x1d9   :  { %v474_v45 = vadd.f32 1e-05, %v472_v44  ;;  %v1016_v44 = vld [vmem:[%s2989_s7 + $0x20] sm:$0xff] }
 0x1db   :  { %1842 = vrsqrt.f32 %v474_v45  ;;  %v1017_v45 = vld [vmem:[%s2989_s7 + $0x28] sm:$0xff] }
 0x1dc   :  { %v1747_v49 = vpack.c.bf16 %v1017_v45, %v1016_v44  ;;  %v794_v44 = vld [vmem:[%s2986_s6 + $0x2a0] sm:$0xff]  ;;  %v796_v45 = vld [vmem:[%s2986_s6 + $0x2b0] sm:$0xff] }
 0x1e5   :  { %v1843_v54 = vpop.eup %1842 }
 0x1e6   :  { %v483_v55 = vrot.slane %v1843_v54, %v2375_v53  ;;  %v2482_v54 = vsub.s32 1, %v2372_v52 }
 0x1e8   :  { %v484_v56 = vcombine.high %v483_v55, %v483_v55 }
 0x1ea   :  { %v491_v58 = vrot.slane %v484_v56, %v2375_v53 }
 0x1ec   :  { %v493_v60 = vmul.f32 %v491_v58, %v473_v57 }
 0x1ee   :  { %v495_v62 = vmul.f32 %v493_v60, %v466_v40  ;;  %v1032_v40 = vld [vmem:[%s2989_s7 + $0xa0] sm:$0xff] }
 0x1ef   :  { %v1745_v43 = vpack.c.bf16 %v1033_v41, %v1032_v40  ;;  %v795_v40 = vld [vmem:[%s2986_s6 + $0x2a8] sm:$0xff]  ;;  %v797_v41 = vld [vmem:[%s2986_s6 + $0x2b8] sm:$0xff] }
 0x1f0   :  { %v496_v4 = vsub.f32 %v494_v61, %v495_v62 }
 0x1f2   :  { %v501_v7 = vrot.slane %v496_v4, %v2386_v63  ;;  %v774_v4 = vld [vmem:[%s2986_s6 + $0x200] sm:$0xff] }
 0x1f4   :  { %v503_v12 = vsel %vm257_vm2, %v493_v60, %v501_v7 }
 0x1f5   :  { %1413 = vmatmul.mubr.msk.f32.vlgmr.msra.gmra.mrb[6].mxu1 %vm520_vm3, %v503_v12 }
 0x1f6   :  { %1604 = vmatpush1.bf16.msra.mxu1 %v1603_v8  ;;  %659 = vmatprep.mubr.f32.mxu1 %v1850_v3 }
 0x1f7   :  { %1606 = vmatprep.subr.bf16.mxu1 %v1605_v9  ;;  %v1675_v9 = vpack.c.bf16 %v776_v5, %v774_v4  ;;  %v809_v4 = vld [vmem:[%s2986_s6 + $0x318] sm:$0xff] }
 0x1fa   :  { %1608 = vmatpush1.bf16.msra.mxu1 %v1607_v13 }
 0x1fb   :  { %1738 = vmatprep.subr.bf16.mxu1 %v1737_v32  ;;  %v786_v32 = vld [vmem:[%s2986_s6 + $0x260] sm:$0xff] }
 0x1fd   :  { %1414 = vmatmul.mubr.msk.f32.vlgmr.msra.gmra.mrb[8].mxu1 %vm520_vm3, %v503_v12 }
 0x1fe   :  { %1740 = vmatpush3.bf16.msra.mxu1 %v1739_v36  ;;  %v1687_v36 = vpack.c.bf16 %v788_v33, %v786_v32 }
 0x1ff   :  { %1742 = vmatprep.subr.bf16.mxu1 %v1741_v37  ;;  %v1689_v37 = vpack.c.bf16 %v793_v35, %v791_v34  ;;  %v826_v34 = vld [vmem:[%s2986_s6 + $0x3a0] sm:$0xff]  ;;  %v828_v35 = vld [vmem:[%s2986_s6 + $0x3b0] sm:$0xff] }
 0x202   :  { %1744 = vmatpush3.bf16.msra.mxu1 %v1743_v42  ;;  %v1691_v42 = vpack.c.bf16 %v792_v39, %v790_v38  ;;  %v1727_v38 = vpack.c.bf16 %v828_v35, %v826_v34 }
 0x203   :  { %1746 = vmatprep.subr.bf16.mxu1 %v1745_v43  ;;  %v1693_v43 = vpack.c.bf16 %v797_v41, %v795_v40  ;;  %v830_v40 = vld [vmem:[%s2986_s6 + $0x3c0] sm:$0xff]  ;;  %v832_v41 = vld [vmem:[%s2986_s6 + $0x3d0] sm:$0xff] }
 0x206   :  { %1748 = vmatpush3.bf16.msra.mxu1 %v1747_v49  ;;  %v1695_v49 = vpack.c.bf16 %v796_v45, %v794_v44  ;;  %v1731_v44 = vpack.c.bf16 %v832_v41, %v830_v40 }
 0x207   :  { %1750 = vmatprep.subr.bf16.mxu1 %v1749_v51  ;;  %v1697_v51 = vpack.c.bf16 %v801_v48, %v799_v46  ;;  %v834_v46 = vld [vmem:[%s2986_s6 + $0x3e0] sm:$0xff]  ;;  %v836_v48 = vld [vmem:[%s2986_s6 + $0x3f0] sm:$0xff] }
 0x2c8   :  { %v590_v55 = vpop.f32.mrb[6].mxu1 }
 0x2c9   :  { %v669_v56 = vrot.slane %v590_v55, %v2386_v63  ;;  %v592_v57 = vpop.f32.mrb[7].mxu1  ;;  %v689_v61 = vrot.slane %v590_v55, %v2482_v54  ;;  %v798_v55 = vld [vmem:[%s2986_s6 + $0x2c0] sm:$0xff] }
 0x2ca   :  { %v673_v58 = vrot.slane %v592_v57, %v2386_v63  ;;  %v693_v1 = vrot.slane %v592_v57, %v2482_v54  ;;  %v803_v57 = vld [vmem:[%s2986_s6 + $0x2e8] sm:$0xff] }
 0x2cb   :  { %v682_v60 = vmul.f32 %v669_v56, %v2141_v47  ;;  %v779_v47 = vld [vmem:[%s2986_s6 + $0x228] sm:$0xff]  ;;  %v800_v56 = vld [vmem:[%s2986_s6 + $0x2d0] sm:$0xff] }
 0x2cc   :  { %v683_v62 = vmul.f32 %v673_v58, %v2147_v50  ;;  %v781_v50 = vld [vmem:[%s2986_s6 + $0x238] sm:$0xff] }
 0x2cd   :  { %v702_v2 = vadd.f32 %v689_v61, %v682_v60  ;;  %v1677_v13 = vpack.c.bf16 %v781_v50, %v779_v47  ;;  %v805_v58 = vld [vmem:[%s2986_s6 + $0x2f8] sm:$0xff]  ;;  %v1699_v60 = vpack.c.bf16 %v800_v56, %v798_v55  ;;  %v806_v47 = vld [vmem:[%s2986_s6 + $0x300] sm:$0xff]  ;;  %v808_v50 = vld [vmem:[%s2986_s6 + $0x310] sm:$0xff] }
 0x2ce   :  { %v703_v6 = vadd.f32 %v693_v1, %v683_v62  ;;  %v1701_v61 = vpack.c.bf16 %v805_v58, %v803_v57  ;;  %v802_v62 = vld [vmem:[%s2986_s6 + $0x2e0] sm:$0xff]  ;;  %v804_v1 = vld [vmem:[%s2986_s6 + $0x2f0] sm:$0xff]  ;;  %v1019_v56 = vld [vmem:[%s2989_s7 + $0x38] sm:$0xff] }
 0x2cf   :  { %v706_v10 = vmax.f32 %v702_v2, 0.0  ;;  %v807_v2 = vld [vmem:[%s2986_s6 + $0x308] sm:$0xff]  ;;  %v1703_v5 = vpack.c.bf16 %v804_v1, %v802_v62  ;;  %v1018_v55 = vld [vmem:[%s2989_s7 + $0x30] sm:$0xff]  ;;  %v1036_v58 = vld [vmem:[%s2989_s7 + $0xc0] sm:$0xff] }
 0x2d0   :  { %v661_v7 = vpop.f32.mrb[8].mxu1  ;;  %v707_v8 = vmax.f32 %v703_v6, 0.0  ;;  %v1705_v6 = vpack.c.bf16 %v809_v4, %v807_v2  ;;  %v1751_v57 = vpack.c.bf16 %v1019_v56, %v1018_v55  ;;  %v1021_v62 = vld [vmem:[%s2989_s7 + $0x48] sm:$0xff]  ;;  %v1038_v2 = vld [vmem:[%s2989_s7 + $0xd0] sm:$0xff]  ;;  %v1039_v4 = vld [vmem:[%s2989_s7 + $0xd8] sm:$0xff] }
 0x2d1   :  { %v677_v11 = vrot.slane %v661_v7, %v2386_v63  ;;  %v663_v12 = vpop.f32.mrb[9].mxu1  ;;  %v697_v20 = vrot.slane %v661_v7, %v2482_v54  ;;  %v811_v7 = vld [vmem:[%s2986_s6 + $0x328] sm:$0xff] }
 0x2d2   :  { %v681_v16 = vrot.slane %v663_v12, %v2386_v63  ;;  %902 = vmatprep.mubr.f32.mxu0 %v707_v8  ;;  %v701_v22 = vrot.slane %v663_v12, %v2482_v54  ;;  %v813_v8 = vld [vmem:[%s2986_s6 + $0x338] sm:$0xff]  ;;  %v812_v12 = vld [vmem:[%s2986_s6 + $0x330] sm:$0xff]  ;;  %1752 = vmatpush3.bf16.msra.mxu1 %v1751_v57  ;;  %v1153_v57 = vld [vmem:[%s2990_s8 + $0x8] sm:$0xff] }
 0x2d3   :  { %v684_v19 = vmul.f32 %v677_v11, %v2155_v59  ;;  %903 = vmatmul.mubr.f32.vlgmr.msra.gmra.mrb[2].mxu0 %v706_v10  ;;  %v784_v59 = vld [vmem:[%s2986_s6 + $0x250] sm:$0xff]  ;;  %v1709_v10 = vpack.c.bf16 %v813_v8, %v811_v7  ;;  %v810_v11 = vld [vmem:[%s2986_s6 + $0x320] sm:$0xff]  ;;  %v1041_v8 = vld [vmem:[%s2989_s7 + $0xe8] sm:$0xff] }
 0x2d4   :  { %v685_v21 = vmul.f32 %v681_v16, %v2161_v0  ;;  %1676 = vmatpush1.bf16.msra.mxu0 %v1675_v9  ;;  %v787_v0 = vld [vmem:[%s2986_s6 + $0x268] sm:$0xff]  ;;  %v1683_v30 = vpack.c.bf16 %v784_v59, %v782_v26  ;;  %v1707_v9 = vpack.c.bf16 %v808_v50, %v806_v47  ;;  %v1711_v15 = vpack.c.bf16 %v812_v12, %v810_v11  ;;  %v825_v59 = vld [vmem:[%s2986_s6 + $0x398] sm:$0xff]  ;;  %v1040_v7 = vld [vmem:[%s2989_s7 + $0xe0] sm:$0xff] }
 0x2d5   :  { %v2520_v24 = vadd.f32 %v697_v20, %v684_v19  ;;  %1678 = vmatprep.subr.bf16.mxu0 %v1677_v13  ;;  %v1685_v31 = vpack.c.bf16 %v789_v28, %v787_v0  ;;  %v815_v13 = vld [vmem:[%s2986_s6 + $0x348] sm:$0xff]  ;;  %v821_v20 = vld [vmem:[%s2986_s6 + $0x378] sm:$0xff]  ;;  %v822_v28 = vld [vmem:[%s2986_s6 + $0x380] sm:$0xff] }
 0x2d6   :  { %v705_v27 = vadd.f32 %v701_v22, %v685_v21  ;;  %v1713_v16 = vpack.c.bf16 %v817_v14, %v815_v13  ;;  %v819_v19 = vld [vmem:[%s2986_s6 + $0x368] sm:$0xff]  ;;  %v1715_v21 = vpack.c.bf16 %v816_v18, %v814_v17  ;;  %v1023_v47 = vld [vmem:[%s2989_s7 + $0x58] sm:$0xff]  ;;  %v1042_v13 = vld [vmem:[%s2989_s7 + $0xf0] sm:$0xff] }
 0x2d7   :  { %v1717_v22 = vpack.c.bf16 %v821_v20, %v819_v19  ;;  %v823_v26 = vld [vmem:[%s2986_s6 + $0x388] sm:$0xff]  ;;  %v1043_v14 = vld [vmem:[%s2989_s7 + $0xf8] sm:$0xff] }
 0x2d8   :  { %1680 = vmatpush1.bf16.msra.mxu0 %v1679_v23  ;;  %v709_v29 = vmax.f32 %v705_v27, 0.0  ;;  %v818_v23 = vld [vmem:[%s2986_s6 + $0x360] sm:$0xff]  ;;  %v1721_v0 = vpack.c.bf16 %v825_v59, %v823_v26  ;;  %v1025_v11 = vld [vmem:[%s2989_s7 + $0x68] sm:$0xff]  ;;  %v1027_v17 = vld [vmem:[%s2989_s7 + $0x78] sm:$0xff] }
 0x2d9   :  { %1682 = vmatprep.subr.bf16.mxu0 %v1681_v25  ;;  %v820_v25 = vld [vmem:[%s2986_s6 + $0x370] sm:$0xff] }
 0x2da   :  { %973 = vmatprep.mubr.f32.mxu0 %v709_v29  ;;  %v1719_v27 = vpack.c.bf16 %v820_v25, %v818_v23  ;;  %v824_v29 = vld [vmem:[%s2986_s6 + $0x390] sm:$0xff] }
 0x2db   :  { %v1723_v32 = vpack.c.bf16 %v824_v29, %v822_v28 }
 0x2dc   :  { %1684 = vmatpush1.bf16.msra.mxu0 %v1683_v30  ;;  %v827_v30 = vld [vmem:[%s2986_s6 + $0x3a8] sm:$0xff] }
 0x2dd   :  { %1686 = vmatprep.subr.bf16.mxu0 %v1685_v31  ;;  %v829_v31 = vld [vmem:[%s2986_s6 + $0x3b8] sm:$0xff] }
 0x2de   :  { %v1725_v33 = vpack.c.bf16 %v829_v31, %v827_v30 }
 0x2e0   :  { %1688 = vmatpush1.bf16.msra.mxu0 %v1687_v36  ;;  %v831_v36 = vld [vmem:[%s2986_s6 + $0x3c8] sm:$0xff] }
 0x2e1   :  { %1690 = vmatprep.subr.bf16.mxu0 %v1689_v37  ;;  %v833_v37 = vld [vmem:[%s2986_s6 + $0x3d8] sm:$0xff] }
 0x2e2   :  { %v1729_v39 = vpack.c.bf16 %v833_v37, %v831_v36 }
 0x2e4   :  { %1692 = vmatpush1.bf16.msra.mxu0 %v1691_v42  ;;  %v835_v42 = vld [vmem:[%s2986_s6 + $0x3e8] sm:$0xff] }
 0x2e5   :  { %1694 = vmatprep.subr.bf16.mxu0 %v1693_v43  ;;  %v837_v43 = vld [vmem:[%s2986_s6 + $0x3f8] sm:$0xff] }
 0x2e6   :  { %v1733_v45 = vpack.c.bf16 %v837_v43, %v835_v42 }
 0x2e8   :  { %1696 = vmatpush1.bf16.msra.mxu0 %v1695_v49  ;;  %v1735_v49 = vpack.c.bf16 %v836_v48, %v834_v46 }
 0x2e9   :  { %1698 = vmatprep.subr.bf16.mxu0 %v1697_v51  ;;  %v708_v51 = vmax.f32 %v2520_v24, 0.0 }
 0x2ec   :  { %1700 = vmatpush1.bf16.msra.mxu0 %v1699_v60  ;;  %v1037_v60 = vld [vmem:[%s2989_s7 + $0xc8] sm:$0xff] }
 0x2ed   :  { %1702 = vmatprep.subr.bf16.mxu0 %v1701_v61  ;;  %v1753_v24 = vpack.c.bf16 %v1037_v60, %v1036_v58  ;;  %v1020_v61 = vld [vmem:[%s2989_s7 + $0x40] sm:$0xff]  ;;  %v1155_v58 = vld [vmem:[%s2990_s8 + $0x18] sm:$0xff] }
 0x2ee   :  { %v1755_v1 = vpack.c.bf16 %v1021_v62, %v1020_v61  ;;  %v1769_v60 = vpack.c.bf16 %v1155_v58, %v1153_v57  ;;  %v1154_v61 = vld [vmem:[%s2990_s8 + $0x10] sm:$0xff]  ;;  %v1276_v57 = vld [vmem:[%s2991_s11 + $0xa0] sm:$0xff] }
 0x2ef   :  { %1754 = vmatprep.subr.bf16.mxu1 %v1753_v24  ;;  %v1152_v24 = vld [vmem:[%s2990_s8] sm:$0xff]  ;;  %v1278_v58 = vld [vmem:[%s2991_s11 + $0xb0] sm:$0xff] }
 0x2f0   :  { %1704 = vmatpush1.bf16.msra.mxu0 %v1703_v5  ;;  %1756 = vmatpush3.bf16.msra.mxu1 %v1755_v1  ;;  %v1757_v5 = vpack.c.bf16 %v1039_v4, %v1038_v2  ;;  %v1771_v62 = vpack.c.bf16 %v1154_v61, %v1152_v24  ;;  %v1259_v1 = vld [vmem:[%s2991_s11 + $0x18] sm:$0xff]  ;;  %v1795_v61 = vpack.c.bf16 %v1278_v58, %v1276_v57  ;;  %v1316_v58 = vld [vmem:[%s2991_s11 + $0x1e0] sm:$0xff] }
 0x2f1   :  { %1706 = vmatprep.subr.bf16.mxu0 %v1705_v6  ;;  %v1022_v6 = vld [vmem:[%s2989_s7 + $0x50] sm:$0xff]  ;;  %v1283_v24 = vld [vmem:[%s2991_s11 + $0xd8] sm:$0xff] }
 0x2f2   :  { %v1759_v50 = vpack.c.bf16 %v1023_v47, %v1022_v6  ;;  %1758 = vmatprep.subr.bf16.mxu1 %v1757_v5 }
 0x2f4   :  { %1708 = vmatpush1.bf16.msra.mxu0 %v1707_v9  ;;  %1760 = vmatpush3.bf16.msra.mxu1 %v1759_v50  ;;  %v1761_v9 = vpack.c.bf16 %v1041_v8, %v1040_v7 }
 0x2f5   :  { %1710 = vmatprep.subr.bf16.mxu0 %v1709_v10  ;;  %v1024_v10 = vld [vmem:[%s2989_s7 + $0x60] sm:$0xff] }
 0x2f6   :  { %v1763_v12 = vpack.c.bf16 %v1025_v11, %v1024_v10  ;;  %1762 = vmatprep.subr.bf16.mxu1 %v1761_v9 }
 0x2f8   :  { %1712 = vmatpush1.bf16.msra.mxu0 %v1711_v15  ;;  %v1026_v15 = vld [vmem:[%s2989_s7 + $0x70] sm:$0xff]  ;;  %1764 = vmatpush3.bf16.msra.mxu1 %v1763_v12 }
 0x2f9   :  { %1714 = vmatprep.subr.bf16.mxu0 %v1713_v16  ;;  %v1765_v16 = vpack.c.bf16 %v1043_v14, %v1042_v13  ;;  %v1767_v18 = vpack.c.bf16 %v1027_v17, %v1026_v15  ;;  %v1121_v14 = vld [vmem:[%s2992_s9] sm:$0x1] }
 0x2fa   :  { %v1142_v17 = vld [vmem:[%s2993_s10] sm:$0x1] }
 0x2fb   :  { %1766 = vmatprep.subr.bf16.mxu1 %v1765_v16 }
 0x2fc   :  { %1716 = vmatpush1.bf16.msra.mxu0 %v1715_v21  ;;  %1768 = vmatpush3.bf16.msra.mxu1 %v1767_v18 }
 0x2fd   :  { %1718 = vmatprep.subr.bf16.mxu0 %v1717_v22  ;;  %1770 = vmatprep.subr.bf16.mxu1 %v1769_v60  ;;  %v1281_v60 = vld [vmem:[%s2991_s11 + $0xc8] sm:$0xff] }
 0x300   :  { %1720 = vmatpush1.bf16.msra.mxu0 %v1719_v27 }
 0x301   :  { %1722 = vmatprep.subr.bf16.mxu0 %v1721_v0 }
 0x304   :  { %1724 = vmatpush1.bf16.msra.mxu0 %v1723_v32 }
 0x305   :  { %1726 = vmatprep.subr.bf16.mxu0 %v1725_v33 }
 0x308   :  { %1728 = vmatpush1.bf16.msra.mxu0 %v1727_v38 }
 0x309   :  { %1730 = vmatprep.subr.bf16.mxu0 %v1729_v39 }
 0x30c   :  { %1732 = vmatpush1.bf16.msra.mxu0 %v1731_v44 }
 0x30d   :  { %1734 = vmatprep.subr.bf16.mxu0 %v1733_v45 }
 0x310   :  { %1736 = vmatpush1.bf16.msra.mxu0 %v1735_v49 }
 0x313   :  { %974 = vmatmul.mubr.f32.vlgmr.msra.gmra.mrb[2].mxu0 %v708_v51 }
 0x3e6   :  { %v2739_v19 = vpop.f32.mrb[2].mxu0 }
 0x3e7   :  { %v980_v20 = vsel %vm196_vm1, %v2739_v19, 0.0  ;;  %v994_v21 = vmul.f32 %v2739_v19, %v2739_v19  ;;  %v2745_v22 = vpop.f32.mrb[3].mxu0 }
 0x3e8   :  { %v981_v23 = vrot.slane %v980_v20, 4  ;;  %v987_v25 = vsel %vm196_vm1, %v2745_v22, 0.0  ;;  %v995_v26 = vmul.f32 %v2745_v22, %v2745_v22 }
 0x3e9   :  { %v996_v59 = vsel %vm196_vm1, %v994_v21, 0.0  ;;  %v988_v27 = vrot.slane %v987_v25, 4  ;;  %v1258_v21 = vld [vmem:[%s2991_s11 + $0x10] sm:$0xff] }
 0x3ea   :  { %v982_v0 = vadd.f32 %v981_v23, %v980_v20  ;;  %v997_v28 = vrot.slane %v996_v59, 4  ;;  %v1003_v29 = vsel %vm196_vm1, %v995_v26, 0.0  ;;  %v1256_v20 = vld [vmem:[%s2991_s11] sm:$0xff] }
 0x3eb   :  { %v989_v30 = vadd.f32 %v988_v27, %v987_v25  ;;  %v1004_v31 = vrot.slane %v1003_v29, 4  ;;  %v1261_v25 = vld [vmem:[%s2991_s11 + $0x28] sm:$0xff] }
 0x3ec   :  { %v983_v32 = vrot.slane %v982_v0, 2  ;;  %v998_v33 = vadd.f32 %v997_v28, %v996_v59  ;;  %v1775_v59 = vpack.c.bf16 %v1258_v21, %v1256_v20  ;;  %v1262_v28 = vld [vmem:[%s2991_s11 + $0x30] sm:$0xff]  ;;  %v1297_v20 = vld [vmem:[%s2991_s11 + $0x148] sm:$0xff]  ;;  %v1299_v21 = vld [vmem:[%s2991_s11 + $0x158] sm:$0xff] }
 0x3ed   :  { %v990_v34 = vrot.slane %v989_v30, 2  ;;  %v1005_v35 = vadd.f32 %v1004_v31, %v1003_v29  ;;  %v1267_v31 = vld [vmem:[%s2991_s11 + $0x58] sm:$0xff] }
 0x3ee   :  { %v984_v36 = vadd.f32 %v983_v32, %v982_v0  ;;  %v999_v37 = vrot.slane %v998_v33, 2  ;;  %v1260_v0 = vld [vmem:[%s2991_s11 + $0x20] sm:$0xff] }
 0x3ef   :  { %v991_v38 = vadd.f32 %v990_v34, %v989_v30  ;;  %v1006_v39 = vrot.slane %v1005_v35, 2  ;;  %v1265_v30 = vld [vmem:[%s2991_s11 + $0x48] sm:$0xff]  ;;  %v1779_v32 = vpack.c.bf16 %v1262_v28, %v1260_v0  ;;  %v1264_v34 = vld [vmem:[%s2991_s11 + $0x40] sm:$0xff] }
 0x3f0   :  { %v1000_v40 = vadd.f32 %v999_v37, %v998_v33  ;;  %v985_v43 = vrot.slane %v984_v36, 1  ;;  %v1781_v33 = vpack.c.bf16 %v1267_v31, %v1265_v30  ;;  %v1271_v37 = vld [vmem:[%s2991_s11 + $0x78] sm:$0xff]  ;;  %v1302_v30 = vld [vmem:[%s2991_s11 + $0x170] sm:$0xff]  ;;  %v1305_v31 = vld [vmem:[%s2991_s11 + $0x188] sm:$0xff] }
 0x3f1   :  { %v992_v41 = vrot.slane %v991_v38, 1  ;;  %v1007_v42 = vadd.f32 %v1006_v39, %v1005_v35  ;;  %v1266_v35 = vld [vmem:[%s2991_s11 + $0x50] sm:$0xff] }
 0x3f2   :  { %v1001_v44 = vrot.slane %v1000_v40, 1  ;;  %v986_v51 = vadd.f32 %v985_v43, %v984_v36  ;;  %v1269_v36 = vld [vmem:[%s2991_s11 + $0x68] sm:$0xff]  ;;  %v1275_v43 = vld [vmem:[%s2991_s11 + $0x98] sm:$0xff] }
 0x3f3   :  { %v1008_v45 = vrot.slane %v1007_v42, 1  ;;  %v993_v48 = vadd.f32 %v992_v41, %v991_v38  ;;  %v1783_v38 = vpack.c.bf16 %v1266_v35, %v1264_v34  ;;  %v1785_v39 = vpack.c.bf16 %v1271_v37, %v1269_v36  ;;  %v1270_v41 = vld [vmem:[%s2991_s11 + $0x70] sm:$0xff]  ;;  %v1304_v35 = vld [vmem:[%s2991_s11 + $0x180] sm:$0xff] }
 0x3f4   :  { %v1002_v46 = vadd.f32 %v1001_v44, %v1000_v40  ;;  %v1268_v40 = vld [vmem:[%s2991_s11 + $0x60] sm:$0xff]  ;;  %v1306_v36 = vld [vmem:[%s2991_s11 + $0x190] sm:$0xff] }
 0x3f5   :  { %v1009_v49 = vadd.f32 %v1008_v45, %v1007_v42  ;;  %v1273_v42 = vld [vmem:[%s2991_s11 + $0x88] sm:$0xff]  ;;  %v1787_v44 = vpack.c.bf16 %v1270_v41, %v1268_v40  ;;  %v1823_v37 = vpack.c.bf16 %v1306_v36, %v1304_v35  ;;  %v1308_v41 = vld [vmem:[%s2991_s11 + $0x1a0] sm:$0xff] }
 0x3f6   :  { %v1010_v56 = vsel %vm257_vm2, %v986_v51, %v1002_v46  ;;  %v1789_v45 = vpack.c.bf16 %v1275_v43, %v1273_v42  ;;  %v1272_v46 = vld [vmem:[%s2991_s11 + $0x80] sm:$0xff]  ;;  %v1279_v51 = vld [vmem:[%s2991_s11 + $0xb8] sm:$0xff]  ;;  %v1310_v42 = vld [vmem:[%s2991_s11 + $0x1b0] sm:$0xff] }
 0x3f7   :  { %v1011_v55 = vsel %vm257_vm2, %v993_v48, %v1009_v49  ;;  %v1274_v48 = vld [vmem:[%s2991_s11 + $0x90] sm:$0xff]  ;;  %v1277_v49 = vld [vmem:[%s2991_s11 + $0xa8] sm:$0xff]  ;;  %v1827_v43 = vpack.c.bf16 %v1310_v42, %v1308_v41 }
 0x3f8   :  { %1108 = vmatprep.mubr.f32.mxu1 %v1011_v55  ;;  %v1791_v55 = vpack.c.bf16 %v1274_v48, %v1272_v46  ;;  %v1312_v48 = vld [vmem:[%s2991_s11 + $0x1c0] sm:$0xff] }
 0x3f9   :  { %1109 = vmatmul.mubr.f32.vlgmr.msra.gmra.mrb[10].mxu1 %v1010_v56  ;;  %v1793_v56 = vpack.c.bf16 %v1279_v51, %v1277_v49  ;;  %v1314_v49 = vld [vmem:[%s2991_s11 + $0x1d0] sm:$0xff] }
 0x3fa   :  { %1223 = vmatprep.mubr.f32.mxu1 %v1850_v3  ;;  %1772 = vmatpush1.bf16.msra.mxu1 %v1771_v62  ;;  %v1257_v3 = vld [vmem:[%s2991_s11 + $0x8] sm:$0xff]  ;;  %v1797_v62 = vpack.c.bf16 %v1283_v24, %v1281_v60  ;;  %v1831_v51 = vpack.c.bf16 %v1314_v49, %v1312_v48  ;;  %v1318_v60 = vld [vmem:[%s2991_s11 + $0x1f0] sm:$0xff] }
 0x3fb   :  { %v1773_v2 = vpack.c.bf16 %v1259_v1, %v1257_v3  ;;  %v1280_v3 = vld [vmem:[%s2991_s11 + $0xc0] sm:$0xff]  ;;  %v1282_v1 = vld [vmem:[%s2991_s11 + $0xd0] sm:$0xff]  ;;  %v1835_v24 = vpack.c.bf16 %v1318_v60, %v1316_v58 }
 0x3fd   :  { %1774 = vmatprep.subr.bf16.mxu1 %v1773_v2  ;;  %v1285_v2 = vld [vmem:[%s2991_s11 + $0xe8] sm:$0xff] }
 0x4cc   :  { %v1518_v4 = vpop.f32.mrb[10].mxu1 }
 0x4cd   :  { %v1519_v5 = vpop.f32.mrb[11].mxu1 }
 0x4ce   :  { %v1520_v6 = vadd.f32 %v1519_v5, %v1518_v4  ;;  %v1287_v4 = vld [vmem:[%s2991_s11 + $0xf8] sm:$0xff]  ;;  %v1799_v5 = vpack.c.bf16 %v1282_v1, %v1280_v3 }
 0x4d0   :  { %v1114_v47 = vmul.f32 0.03125, %v1520_v6  ;;  %v1801_v6 = vpack.c.bf16 %v1287_v4, %v1285_v2 }
 0x4d2   :  { %v1115_v50 = vmul.f32 %v1114_v47, %v1114_v47 }
 0x4d4   :  { %v1117_v7 = vrot.slane %v1115_v50, 7  ;;  %v1286_v50 = vld [vmem:[%s2991_s11 + $0xf0] sm:$0xff] }
 0x4d6   :  { %v1119_v8 = vsub.f32 %v1114_v47, %v1117_v7  ;;  %v1289_v7 = vld [vmem:[%s2991_s11 + $0x108] sm:$0xff] }
 0x4d8   :  { %v1120_v9 = vmax.f32 %v1119_v8, 0.0  ;;  %v1291_v8 = vld [vmem:[%s2991_s11 + $0x118] sm:$0xff] }
 0x4da   :  { %v1122_v10 = vadd.f32 1e-05, %v1120_v9 }
 0x4dc   :  { %1844 = vrsqrt.f32 %v1122_v10  ;;  %v1805_v10 = vpack.c.bf16 %v1291_v8, %v1289_v7 }
 0x4e6   :  { %v1845_v11 = vpop.eup %1844 }
 0x4e7   :  { %v1131_v12 = vrot.slane %v1845_v11, %v2375_v53  ;;  %v1288_v11 = vld [vmem:[%s2991_s11 + $0x100] sm:$0xff] }
 0x4e9   :  { %v1132_v13 = vcombine.high %v1131_v12, %v1131_v12  ;;  %v1290_v12 = vld [vmem:[%s2991_s11 + $0x110] sm:$0xff] }
 0x4eb   :  { %v1139_v15 = vrot.slane %v1132_v13, %v2375_v53  ;;  %v1263_v53 = vld [vmem:[%s2991_s11 + $0x38] sm:$0xff]  ;;  %v1293_v13 = vld [vmem:[%s2991_s11 + $0x128] sm:$0xff] }
 0x4ec   :  { %v1777_v27 = vpack.c.bf16 %v1263_v53, %v1261_v25  ;;  %v1813_v25 = vpack.c.bf16 %v1299_v21, %v1297_v20  ;;  %v1296_v53 = vld [vmem:[%s2991_s11 + $0x140] sm:$0xff] }
 0x4ed   :  { %v1141_v16 = vmul.f32 %v1139_v15, %v1121_v14  ;;  %v1295_v14 = vld [vmem:[%s2991_s11 + $0x138] sm:$0xff]  ;;  %v1807_v15 = vpack.c.bf16 %v1290_v12, %v1288_v11 }
 0x4ef   :  { %v1143_v18 = vmul.f32 %v1141_v16, %v1114_v47  ;;  %v1284_v47 = vld [vmem:[%s2991_s11 + $0xe0] sm:$0xff] }
 0x4f0   :  { %v1803_v9 = vpack.c.bf16 %v1286_v50, %v1284_v47 }
 0x4f1   :  { %v1144_v23 = vsub.f32 %v1142_v17, %v1143_v18  ;;  %v1292_v17 = vld [vmem:[%s2991_s11 + $0x120] sm:$0xff]  ;;  %v1294_v18 = vld [vmem:[%s2991_s11 + $0x130] sm:$0xff] }
 0x4f3   :  { %v1149_v26 = vrot.slane %v1144_v23, %v2386_v63  ;;  %v1811_v23 = vpack.c.bf16 %v1294_v18, %v1292_v17 }
 0x4f5   :  { %v1151_v29 = vsel %vm257_vm2, %v1141_v16, %v1149_v26  ;;  %v1809_v16 = vpack.c.bf16 %v1295_v14, %v1293_v13  ;;  %v1298_v26 = vld [vmem:[%s2991_s11 + $0x150] sm:$0xff] }
 0x4f6   :  { %1415 = vmatmul.mubr.msk.f32.vlgmr.msra.gmra.mrb[12].mxu1 %vm50_vm0, %v1151_v29  ;;  %v1815_v0 = vpack.c.bf16 %v1298_v26, %v1296_v53  ;;  %v1300_v29 = vld [vmem:[%s2991_s11 + $0x160] sm:$0xff] }
 0x4f7   :  { %1776 = vmatpush1.bf16.msra.mxu1 %v1775_v59  ;;  %v1301_v59 = vld [vmem:[%s2991_s11 + $0x168] sm:$0xff] }
 0x4f8   :  { %1778 = vmatprep.subr.bf16.mxu1 %v1777_v27  ;;  %v1303_v27 = vld [vmem:[%s2991_s11 + $0x178] sm:$0xff] }
 0x4f9   :  { %v1817_v28 = vpack.c.bf16 %v1303_v27, %v1301_v59 }
 0x4fb   :  { %1780 = vmatpush1.bf16.msra.mxu1 %v1779_v32  ;;  %v1307_v32 = vld [vmem:[%s2991_s11 + $0x198] sm:$0xff] }
 0x4fc   :  { %1782 = vmatprep.subr.bf16.mxu1 %v1781_v33  ;;  %v1819_v33 = vpack.c.bf16 %v1302_v30, %v1300_v29  ;;  %v1821_v34 = vpack.c.bf16 %v1307_v32, %v1305_v31 }
 0x4ff   :  { %1784 = vmatpush1.bf16.msra.mxu1 %v1783_v38  ;;  %v1309_v38 = vld [vmem:[%s2991_s11 + $0x1a8] sm:$0xff] }
 0x500   :  { %1786 = vmatprep.subr.bf16.mxu1 %v1785_v39  ;;  %v1311_v39 = vld [vmem:[%s2991_s11 + $0x1b8] sm:$0xff] }
 0x501   :  { %v1825_v40 = vpack.c.bf16 %v1311_v39, %v1309_v38 }
 0x503   :  { %1788 = vmatpush1.bf16.msra.mxu1 %v1787_v44  ;;  %v1313_v44 = vld [vmem:[%s2991_s11 + $0x1c8] sm:$0xff] }
 0x504   :  { %1790 = vmatprep.subr.bf16.mxu1 %v1789_v45  ;;  %v1315_v45 = vld [vmem:[%s2991_s11 + $0x1d8] sm:$0xff] }
 0x505   :  { %v1829_v46 = vpack.c.bf16 %v1315_v45, %v1313_v44 }
 0x507   :  { %1792 = vmatpush1.bf16.msra.mxu1 %v1791_v55  ;;  %v1317_v55 = vld [vmem:[%s2991_s11 + $0x1e8] sm:$0xff] }
 0x508   :  { %1794 = vmatprep.subr.bf16.mxu1 %v1793_v56  ;;  %v1319_v56 = vld [vmem:[%s2991_s11 + $0x1f8] sm:$0xff] }
 0x509   :  { %v1833_v57 = vpack.c.bf16 %v1319_v56, %v1317_v55 }
 0x50b   :  { %1796 = vmatpush1.bf16.msra.mxu1 %v1795_v61 }
 0x50c   :  { %1798 = vmatprep.subr.bf16.mxu1 %v1797_v62 }
 0x50f   :  { %1800 = vmatpush1.bf16.msra.mxu1 %v1799_v5 }
 0x510   :  { %1802 = vmatprep.subr.bf16.mxu1 %v1801_v6 }
 0x513   :  { %1804 = vmatpush1.bf16.msra.mxu1 %v1803_v9 }
 0x514   :  { %1806 = vmatprep.subr.bf16.mxu1 %v1805_v10 }
 0x517   :  { %1808 = vmatpush1.bf16.msra.mxu1 %v1807_v15 }
 0x518   :  { %1810 = vmatprep.subr.bf16.mxu1 %v1809_v16 }
 0x51b   :  { %1812 = vmatpush1.bf16.msra.mxu1 %v1811_v23 }
 0x51c   :  { %1814 = vmatprep.subr.bf16.mxu1 %v1813_v25 }
 0x51f   :  { %1816 = vmatpush1.bf16.msra.mxu1 %v1815_v0 }
 0x520   :  { %1818 = vmatprep.subr.bf16.mxu1 %v1817_v28 }
 0x523   :  { %1820 = vmatpush1.bf16.msra.mxu1 %v1819_v33 }
 0x524   :  { %1822 = vmatprep.subr.bf16.mxu1 %v1821_v34 }
 0x527   :  { %1824 = vmatpush1.bf16.msra.mxu1 %v1823_v37 }
 0x528   :  { %1826 = vmatprep.subr.bf16.mxu1 %v1825_v40 }
 0x52b   :  { %1828 = vmatpush1.bf16.msra.mxu1 %v1827_v43 }
 0x52c   :  { %1830 = vmatprep.subr.bf16.mxu1 %v1829_v46 }
 0x52f   :  { %1832 = vmatpush1.bf16.msra.mxu1 %v1831_v51 }
 0x530   :  { %1834 = vmatprep.subr.bf16.mxu1 %v1833_v57 }
 0x533   :  { %1836 = vmatpush1.bf16.msra.mxu1 %v1835_v24 }
 0x5c9   :  { %v1225_v61 = vpop.f32.mrb[12].mxu1 }
 0x5ca   :  { %v1233_v62 = vrot.slane %v1225_v61, %v2386_v63  ;;  %v1227_v3 = vpop.f32.mrb[13].mxu1  ;;  %v1243_v4 = vrot.slane %v1225_v61, %v2482_v54 }
 0x5cb   :  { %v1237_v1 = vrot.slane %v1227_v3, %v2386_v63  ;;  %v1247_v6 = vrot.slane %v1227_v3, %v2482_v54 }
 0x5cc   :  { %v1238_v2 = vmul.f32 %v1233_v62, %v2739_v19  ;;  %v1852_v19 = vmov 1983009808  }
 0x5cd   :  { %v1239_v5 = vmul.f32 %v1237_v1, %v2745_v22  ;;  %v1397_v12 = vunpack.c.l.s4 %v1852_v19 }
 0x5ce   :  { %v1248_v47 = vadd.f32 %v1243_v4, %v1238_v2 }
 0x5cf   :  { %v1249_v50 = vadd.f32 %v1247_v6, %v1239_v5  ;;  %v1398_v13 = vunpack.c.0.s8 %v1397_v12 }
 0x5d0   :  { %v1252_v7 = vmul.f32 0.2, %v1248_v47  ;;  %vm1250_vm5 = vcmp.gt.f32.partialorder %v1248_v47, 0.0 }
 0x5d1   :  { %vm1251_vm4 = vcmp.gt.f32.partialorder %v1249_v50, 0.0  ;;  %v1253_v8 = vmul.f32 0.2, %v1249_v50  ;;  %v1401_v54 = vsub.s32 %v1398_v13, %v2372_v52 }
 0x5d2   :  { %v1254_v10 = vsel %vm1250_vm5, %v1248_v47, %v1252_v7 }
 0x5d3   :  { %v1255_v9 = vsel %vm1251_vm4, %v1249_v50, %v1253_v8 }
 0x5d4   :  { %1384 = vmatprep.mubr.f32.mxu1 %v1255_v9 }
 0x5d5   :  { %1385 = vmatmul.mubr.f32.vlgmr.msra.gmra.mrb[14].mxu1 %v1254_v10 }
 0x6a8   :  { %v1386_v11 = vpop.f32.mrb[14].mxu1 }
 0x6a9   :  { %1846 = vtanh.f32 %v1386_v11  ;;  %v1388_v63 = vpop.f32.mrb[15].mxu1 }
 0x6aa   :  { %1848 = vtanh.f32 %v1388_v63 }
 0x6b3   :  { %v1847_v22 = vpop.eup %1846 }
 0x6b4   :  { %v1849_v14 = vpop.eup %1848 }
 0x6b5   :  { %v1395_v15 = vcombine.low %v1847_v22, %v1849_v14 }
 0x6b7   :  { %v1402_v16 = vrot.slane %v1395_v15, %v1401_v54 }
 0x6b9   :  { %1406 = vst.msk [vmem:[%s2994_s12] sm:$0xf] %vm1405_vm7, %v1402_v16 }

</bundles_post_ra>
